<compile_context>
chip_gen: v6e
topology: v6e:2x2x1
jax: 0.10.0
libtpu: 0.0.40
codegen_flags: <defaults>
</compile_context>

<pallas_src>
import numpy as np

import jax
import jax.numpy as jnp
from jax import lax
from jax.experimental import pallas as pl
from jax.experimental.pallas import tpu as pltpu


# --------------------------- one-time weight packing ---------------------------

def _banded_fused(w_oihw, w_in, k_pad):
    """Parity-fused banded conv matrices, shape (KH, k_pad, 256).

    conv_out[h, 2*wo+p, co] = sum_di (x_slab[h+di, :] @ m[di])[p*128 + wo*cout + co]
    where x_slab lanes are (w_in * cin):  lane = w * cin + ci.
    """
    w = np.asarray(w_oihw, np.float32)                  # (Cout, Cin, KH, KW)
    cout, cin, kh, kw = w.shape
    ow = w_in - kw + 1
    owp = ow // 2
    m = np.zeros((kh, k_pad, 256), np.float32)
    for di in range(kh):
        for p in range(2):                              # W-parity -> lane half
            for wo in range(owp):
                for dj in range(kw):
                    wi = 2 * wo + p + dj
                    m[di, wi * cin:(wi + 1) * cin,
                      p * 128 + wo * cout: p * 128 + (wo + 1) * cout] = w[:, :, di, dj].T
    return m


def prepare_params(p):
    """Pack torch-layout params into kernel layout (hoisted out of the forward)."""
    c1w = np.asarray(p["conv1_w"], np.float32)          # (10, 3, 5, 5)
    c2w = np.asarray(p["conv2_w"], np.float32)          # (20, 10, 5, 5)
    cout2 = c2w.shape[0]
    kp = {}

    kp["m1"] = jnp.asarray(_banded_fused(c1w, 28, 84), jnp.bfloat16)      # (5, 84, 256)
    b1 = np.zeros((1, 128), np.float32)
    b1[0, :120] = np.tile(np.asarray(p["conv1_b"], np.float32), 12)
    kp["b1"] = jnp.asarray(b1)

    kp["m2"] = jnp.asarray(_banded_fused(c2w, 12, 128), jnp.bfloat16)     # (5, 128, 256)
    b2 = np.zeros((1, 128), np.float32)
    b2[0, :80] = np.tile(np.asarray(p["conv2_b"], np.float32), 4)
    kp["b2"] = jnp.asarray(b2)

    # fc1: torch columns are (c2, h2, w2); our activation lanes are (w2, c2) per row h2.
    w1 = np.asarray(p["fc1_w"], np.float32).reshape(50, cout2, 4, 4)
    w1 = w1.transpose(2, 3, 1, 0).reshape(4, 4 * cout2, 50)               # (4, 80, 50)
    w1p = np.zeros((4, 128, 128), np.float32)
    w1p[:, :4 * cout2, :50] = w1
    kp["w1"] = jnp.asarray(w1p, jnp.bfloat16)
    bf1 = np.zeros((1, 128), np.float32)
    bf1[0, :50] = np.asarray(p["fc1_b"], np.float32)
    kp["bf1"] = jnp.asarray(bf1)

    w2p = np.zeros((128, 128), np.float32)
    w2p[:50, :10] = np.asarray(p["fc2_w"], np.float32).T
    kp["w2"] = jnp.asarray(w2p, jnp.bfloat16)
    bf2 = np.zeros((1, 128), np.float32)
    bf2[0, :10] = np.asarray(p["fc2_b"], np.float32)
    kp["bf2"] = jnp.asarray(bf2)
    return kp


# --------------------------------- the kernel ---------------------------------

def _neighbor(x, delta):
    """out[i] = x[i + delta] (rows); edge rows replicate (never selected)."""
    d = abs(delta)
    if delta > 0:
        return jnp.concatenate([x[d:], x[-d:]], axis=0)
    return jnp.concatenate([x[:d], x[:-d]], axis=0)


def _pair_max_dup(x, step):
    """out[i] = max(x[i], x[i ^ step]) for every row i (step is a power of 2)."""
    rid = lax.broadcasted_iota(jnp.int32, x.shape, 0)
    nb = jnp.where((rid & step) == 0, _neighbor(x, step), _neighbor(x, -step))
    return jnp.maximum(x, nb)


def _net_kernel(x_ref, m1_ref, b1_ref, m2_ref, b2_ref, w1_ref, bf1_ref,
                w2_ref, bf2_ref, o_ref):
    bt = x_ref.shape[0]
    x3 = x_ref[...]                                      # (bt, 28, 84) bf16

    # ---- conv1 (+ fused 2x2 max-pool + relu) -------------------------------
    acc1 = None
    for di in range(5):                                  # conv kernel rows
        lhs = x3[:, di:di + 24, :].reshape(bt * 24, 84)  # fold batch into M
        t = jnp.dot(lhs, m1_ref[di], preferred_element_type=jnp.float32)
        acc1 = t if acc1 is None else acc1 + t           # (bt*24, 256)
    z1 = jnp.maximum(acc1[:, :128], acc1[:, 128:]) + b1_ref[...]   # W-pool + bias
    # H-pool in duplicated-row form: row h holds pooled value for pair h//2.
    a1 = jnp.maximum(_pair_max_dup(z1, 1), 0.0).astype(jnp.bfloat16)  # (bt*24, 128)

    # ---- conv2 (reads the duplicated a1 rows with contiguous slices) -------
    # TODO(synk): nn.Dropout2d / F.dropout are inference-mode identity here.
    a1_3 = a1.reshape(bt, 24, 128)
    acc2 = None
    for di in range(5):
        lhs = a1_3[:, 2 * di:2 * di + 16, :].reshape(bt * 16, 128)
        t = jnp.dot(lhs, m2_ref[di], preferred_element_type=jnp.float32)
        acc2 = t if acc2 is None else acc2 + t           # (bt*16, 256)
    z2 = jnp.maximum(acc2[:, :128], acc2[:, 128:]) + b2_ref[...]   # W-pool + bias
    # rows of z2 are already x2-duplicated, so one xor-2 max completes the 2x2 pool
    a2 = jnp.maximum(_pair_max_dup(z2, 2), 0.0).astype(jnp.bfloat16)  # (bt*16, 128)
    a2_3 = a2.reshape(bt, 16, 128)

    # ---- fc1: 4 batched row-block matmuls (one per pooled H row) -----------
    h = bf1_ref[...]                                     # (1, 128) f32
    for r in range(4):
        h = h + jnp.dot(a2_3[:, 4 * r, :], w1_ref[r],
                        preferred_element_type=jnp.float32)          # (bt, 128)
    hb = jnp.maximum(h, 0.0).astype(jnp.bfloat16)

    # ---- fc2 + masked log_softmax (classes live in lanes 0..9) -------------
    logits = jnp.dot(hb, w2_ref[...], preferred_element_type=jnp.float32) + bf2_ref[...]
    lane = lax.broadcasted_iota(jnp.int32, logits.shape, 1)
    valid = lane < 10
    lmax = jnp.max(jnp.where(valid, logits, -1e30), axis=-1, keepdims=True)
    s = logits - lmax
    lse = jnp.log(jnp.sum(jnp.where(valid, jnp.exp(s), 0.0), axis=-1, keepdims=True))
    o_ref[...] = s - lse                                 # (bt, 128) lane-dense store


# --------------------------------- forward ------------------------------------

def net_forward(x_nchw, kp, b_tile=64):
    n, c, hh, ww = x_nchw.shape
    assert (c, hh, ww) == (3, 28, 28), "Net expects 3x28x28 inputs"
    # NCHW -> lane-dense slab (N, H, W*C); the only per-forward layout op.
    x = jnp.transpose(x_nchw, (0, 2, 3, 1)).reshape(n, hh, ww * c).astype(jnp.bfloat16)

    bt = n if n < b_tile else b_tile
    npad = ((n + bt - 1) // bt) * bt
    if npad != n:
        x = jnp.concatenate(
            [x, jnp.zeros((npad - n, hh, ww * c), x.dtype)], axis=0)

    def wspec(a):
        return pl.BlockSpec(a.shape, lambda i, nd=a.ndim: (0,) * nd)

    order = ("m1", "b1", "m2", "b2", "w1", "bf1", "w2", "bf2")
    out = pl.pallas_call(
        _net_kernel,
        out_shape=jax.ShapeDtypeStruct((npad, 128), jnp.float32),
        grid=(npad // bt,),
        in_specs=[pl.BlockSpec((bt, hh, ww * c), lambda i: (i, 0, 0))]
                 + [wspec(kp[k]) for k in order],
        out_specs=pl.BlockSpec((bt, 128), lambda i: (i, 0)),
        compiler_params=pltpu.CompilerParams(dimension_semantics=("parallel",)),
    )(x, *[kp[k] for k in order])
    return out[:n, :10]


# ----------------------------- reference & params ------------------------------

def _maxpool2_nchw(y):
    n, c, h, w = y.shape
    return jnp.max(y.reshape(n, c, h // 2, 2, w // 2, 2), axis=(3, 5))


def reference_forward(x, p):
    dn = ("NCHW", "OIHW", "NCHW")
    y = lax.conv_general_dilated(x, p["conv1_w"], (1, 1), "VALID", dimension_numbers=dn)
    y = y + p["conv1_b"][None, :, None, None]
    y = jnp.maximum(_maxpool2_nchw(y), 0.0)
    y = lax.conv_general_dilated(y, p["conv2_w"], (1, 1), "VALID", dimension_numbers=dn)
    y = y + p["conv2_b"][None, :, None, None]
    y = jnp.maximum(_maxpool2_nchw(y), 0.0)
    y = y.reshape(y.shape[0], -1)
    y = jnp.maximum(y @ p["fc1_w"].T + p["fc1_b"], 0.0)
    y = y @ p["fc2_w"].T + p["fc2_b"]
    return jax.nn.log_softmax(y, axis=-1)


def init_params(key):
    ks = jax.random.split(key, 8)

    def u(k, shape, fan_in):
        b = 1.0 / np.sqrt(fan_in)
        return jax.random.uniform(k, shape, jnp.float32, -b, b)

    return {
        "conv1_w": u(ks[0], (10, 3, 5, 5), 3 * 25),
        "conv1_b": u(ks[1], (10,), 3 * 25),
        "conv2_w": u(ks[2], (20, 10, 5, 5), 10 * 25),
        "conv2_b": u(ks[3], (20,), 10 * 25),
        "fc1_w": u(ks[4], (50, 320), 320),
        "fc1_b": u(ks[5], (50,), 320),
        "fc2_w": u(ks[6], (10, 50), 50),
        "fc2_b": u(ks[7], (10,), 50),
    }


# ----------------------------------- main ---------------------------------------

if __name__ == "__main__":
    params = init_params(jax.random.PRNGKey(1))
    kparams = prepare_params(params)            # one-time weight packing

    fwd = jax.jit(net_forward)

    # batch=2: tiny-shape sanity check; batch=80: exercises B_TILE=64,
    # batch padding (80 -> 128) and a 2-step "parallel" grid.
    for batch in (2, 80):
        x = jax.random.normal(jax.random.PRNGKey(0), (batch, 3, 28, 28), jnp.float32)
        logits = fwd(x, kparams)
        jax.block_until_ready(logits)

        assert logits.shape == (batch, 10), logits.shape
        assert logits.dtype == jnp.float32
        assert bool(jnp.all(jnp.isfinite(logits)))

        ref = reference_forward(x, params)
        err = float(jnp.max(jnp.abs(logits - ref)))
        assert err < 5e-2, f"batch={batch}: mismatch vs reference: {err}"

    print("KERNEL_OK")
</pallas_src>

<mosaic_0001>
module attributes {stable_mosaic.version = 11 : i64} {
  func.func @_net_kernel(%arg0: i32, %arg1: memref<2x28x84xbf16, #tpu.memory_space<vmem>>, %arg2: memref<5x84x256xbf16, #tpu.memory_space<vmem>>, %arg3: memref<1x128xf32, #tpu.memory_space<vmem>>, %arg4: memref<5x128x256xbf16, #tpu.memory_space<vmem>>, %arg5: memref<1x128xf32, #tpu.memory_space<vmem>>, %arg6: memref<4x128x128xbf16, #tpu.memory_space<vmem>>, %arg7: memref<1x128xf32, #tpu.memory_space<vmem>>, %arg8: memref<128x128xbf16, #tpu.memory_space<vmem>>, %arg9: memref<1x128xf32, #tpu.memory_space<vmem>>, %arg10: memref<2x128xf32, #tpu.memory_space<vmem>>) attributes {dimension_semantics = [#tpu.dimension_semantics<parallel>], iteration_bounds = array<i64: 1>, scalar_prefetch = 0 : i64, scratch_operands = 0 : i64, tpu.core_type = #tpu.core_type<tc>, window_params = [{transform_indices = @transform_0, window_bounds = array<i64: 2, 28, 84>}, {pipeline_mode = #tpu.pipeline_mode<synchronous>, transform_indices = @transform_1, window_bounds = array<i64: 5, 84, 256>}, {pipeline_mode = #tpu.pipeline_mode<synchronous>, transform_indices = @transform_2, window_bounds = array<i64: 1, 128>}, {pipeline_mode = #tpu.pipeline_mode<synchronous>, transform_indices = @transform_3, window_bounds = array<i64: 5, 128, 256>}, {pipeline_mode = #tpu.pipeline_mode<synchronous>, transform_indices = @transform_4, window_bounds = array<i64: 1, 128>}, {pipeline_mode = #tpu.pipeline_mode<synchronous>, transform_indices = @transform_5, window_bounds = array<i64: 4, 128, 128>}, {pipeline_mode = #tpu.pipeline_mode<synchronous>, transform_indices = @transform_6, window_bounds = array<i64: 1, 128>}, {pipeline_mode = #tpu.pipeline_mode<synchronous>, transform_indices = @transform_7, window_bounds = array<i64: 128, 128>}, {pipeline_mode = #tpu.pipeline_mode<synchronous>, transform_indices = @transform_8, window_bounds = array<i64: 1, 128>}, {transform_indices = @transform_9, window_bounds = array<i64: 2, 128>}]} {
    %c0 = arith.constant 0 : index
    %c0_0 = arith.constant 0 : index
    %c0_1 = arith.constant 0 : index
    %0 = vector.load %arg1[%c0, %c0_0, %c0_1] : memref<2x28x84xbf16, #tpu.memory_space<vmem>>, vector<2x28x84xbf16>
    %1 = vector.extract_strided_slice %0 {offsets = [0, 0, 0], sizes = [2, 24, 84], strides = [1, 1, 1]} : vector<2x28x84xbf16> to vector<2x24x84xbf16>
    %2 = vector.shape_cast %1 : vector<2x24x84xbf16> to vector<48x84xbf16>
    %c0_2 = arith.constant 0 : index
    %c0_3 = arith.constant 0 : index
    %c0_4 = arith.constant 0 : index
    %3 = vector.load %arg2[%c0_2, %c0_3, %c0_4] : memref<5x84x256xbf16, #tpu.memory_space<vmem>>, vector<1x84x256xbf16>
    %4 = vector.shape_cast %3 : vector<1x84x256xbf16> to vector<84x256xbf16>
    %cst = arith.constant dense<0.000000e+00> : vector<48x256xf32>
    %5 = tpu.matmul %2, %4, %cst {dimension_numbers = #tpu.dot_dimension_numbers<[1], [0], [0], [1], [0, 0, 1, 1], [], []>} : vector<48x84xbf16>, vector<84x256xbf16>, vector<48x256xf32> -> vector<48x256xf32>
    %6 = vector.extract_strided_slice %0 {offsets = [0, 1, 0], sizes = [2, 24, 84], strides = [1, 1, 1]} : vector<2x28x84xbf16> to vector<2x24x84xbf16>
    %7 = vector.shape_cast %6 : vector<2x24x84xbf16> to vector<48x84xbf16>
    %c1 = arith.constant 1 : index
    %c0_5 = arith.constant 0 : index
    %c0_6 = arith.constant 0 : index
    %8 = vector.load %arg2[%c1, %c0_5, %c0_6] : memref<5x84x256xbf16, #tpu.memory_space<vmem>>, vector<1x84x256xbf16>
    %9 = vector.shape_cast %8 : vector<1x84x256xbf16> to vector<84x256xbf16>
    %cst_7 = arith.constant dense<0.000000e+00> : vector<48x256xf32>
    %10 = tpu.matmul %7, %9, %cst_7 {dimension_numbers = #tpu.dot_dimension_numbers<[1], [0], [0], [1], [0, 0, 1, 1], [], []>} : vector<48x84xbf16>, vector<84x256xbf16>, vector<48x256xf32> -> vector<48x256xf32>
    %11 = arith.addf %5, %10 : vector<48x256xf32>
    %12 = vector.extract_strided_slice %0 {offsets = [0, 2, 0], sizes = [2, 24, 84], strides = [1, 1, 1]} : vector<2x28x84xbf16> to vector<2x24x84xbf16>
    %13 = vector.shape_cast %12 : vector<2x24x84xbf16> to vector<48x84xbf16>
    %c2 = arith.constant 2 : index
    %c0_8 = arith.constant 0 : index
    %c0_9 = arith.constant 0 : index
    %14 = vector.load %arg2[%c2, %c0_8, %c0_9] : memref<5x84x256xbf16, #tpu.memory_space<vmem>>, vector<1x84x256xbf16>
    %15 = vector.shape_cast %14 : vector<1x84x256xbf16> to vector<84x256xbf16>
    %cst_10 = arith.constant dense<0.000000e+00> : vector<48x256xf32>
    %16 = tpu.matmul %13, %15, %cst_10 {dimension_numbers = #tpu.dot_dimension_numbers<[1], [0], [0], [1], [0, 0, 1, 1], [], []>} : vector<48x84xbf16>, vector<84x256xbf16>, vector<48x256xf32> -> vector<48x256xf32>
    %17 = arith.addf %11, %16 : vector<48x256xf32>
    %18 = vector.extract_strided_slice %0 {offsets = [0, 3, 0], sizes = [2, 24, 84], strides = [1, 1, 1]} : vector<2x28x84xbf16> to vector<2x24x84xbf16>
    %19 = vector.shape_cast %18 : vector<2x24x84xbf16> to vector<48x84xbf16>
    %c3 = arith.constant 3 : index
    %c0_11 = arith.constant 0 : index
    %c0_12 = arith.constant 0 : index
    %20 = vector.load %arg2[%c3, %c0_11, %c0_12] : memref<5x84x256xbf16, #tpu.memory_space<vmem>>, vector<1x84x256xbf16>
    %21 = vector.shape_cast %20 : vector<1x84x256xbf16> to vector<84x256xbf16>
    %cst_13 = arith.constant dense<0.000000e+00> : vector<48x256xf32>
    %22 = tpu.matmul %19, %21, %cst_13 {dimension_numbers = #tpu.dot_dimension_numbers<[1], [0], [0], [1], [0, 0, 1, 1], [], []>} : vector<48x84xbf16>, vector<84x256xbf16>, vector<48x256xf32> -> vector<48x256xf32>
    %23 = arith.addf %17, %22 : vector<48x256xf32>
    %24 = vector.extract_strided_slice %0 {offsets = [0, 4, 0], sizes = [2, 24, 84], strides = [1, 1, 1]} : vector<2x28x84xbf16> to vector<2x24x84xbf16>
    %25 = vector.shape_cast %24 : vector<2x24x84xbf16> to vector<48x84xbf16>
    %c4 = arith.constant 4 : index
    %c0_14 = arith.constant 0 : index
    %c0_15 = arith.constant 0 : index
    %26 = vector.load %arg2[%c4, %c0_14, %c0_15] : memref<5x84x256xbf16, #tpu.memory_space<vmem>>, vector<1x84x256xbf16>
    %27 = vector.shape_cast %26 : vector<1x84x256xbf16> to vector<84x256xbf16>
    %cst_16 = arith.constant dense<0.000000e+00> : vector<48x256xf32>
    %28 = tpu.matmul %25, %27, %cst_16 {dimension_numbers = #tpu.dot_dimension_numbers<[1], [0], [0], [1], [0, 0, 1, 1], [], []>} : vector<48x84xbf16>, vector<84x256xbf16>, vector<48x256xf32> -> vector<48x256xf32>
    %29 = arith.addf %23, %28 : vector<48x256xf32>
    %30 = vector.extract_strided_slice %29 {offsets = [0, 0], sizes = [48, 128], strides = [1, 1]} : vector<48x256xf32> to vector<48x128xf32>
    %31 = vector.extract_strided_slice %29 {offsets = [0, 128], sizes = [48, 128], strides = [1, 1]} : vector<48x256xf32> to vector<48x128xf32>
    %32 = arith.maximumf %30, %31 : vector<48x128xf32>
    %c0_17 = arith.constant 0 : index
    %c0_18 = arith.constant 0 : index
    %33 = vector.load %arg3[%c0_17, %c0_18] : memref<1x128xf32, #tpu.memory_space<vmem>>, vector<1x128xf32>
    %34 = vector.broadcast %33 : vector<1x128xf32> to vector<48x128xf32>
    %35 = arith.addf %32, %34 : vector<48x128xf32>
    %36 = tpu.iota {dimensions = array<i32: 0>} : vector<48x128xi32>
    %c1_i32 = arith.constant 1 : i32
    %37 = vector.broadcast %c1_i32 : i32 to vector<48x128xi32>
    %38 = arith.andi %36, %37 : vector<48x128xi32>
    %c0_i32 = arith.constant 0 : i32
    %39 = vector.broadcast %c0_i32 : i32 to vector<48x128xi32>
    %40 = arith.cmpi eq, %38, %39 : vector<48x128xi32>
    %41 = vector.extract_strided_slice %35 {offsets = [1, 0], sizes = [47, 128], strides = [1, 1]} : vector<48x128xf32> to vector<47x128xf32>
    %42 = vector.extract_strided_slice %35 {offsets = [47, 0], sizes = [1, 128], strides = [1, 1]} : vector<48x128xf32> to vector<1x128xf32>
    %43 = tpu.concatenate %41, %42 in 0 : vector<47x128xf32>, vector<1x128xf32> -> vector<48x128xf32>
    %44 = vector.extract_strided_slice %35 {offsets = [0, 0], sizes = [1, 128], strides = [1, 1]} : vector<48x128xf32> to vector<1x128xf32>
    %45 = vector.extract_strided_slice %35 {offsets = [0, 0], sizes = [47, 128], strides = [1, 1]} : vector<48x128xf32> to vector<47x128xf32>
    %46 = tpu.concatenate %44, %45 in 0 : vector<1x128xf32>, vector<47x128xf32> -> vector<48x128xf32>
    %47 = arith.select %40, %43, %46 : vector<48x128xi1>, vector<48x128xf32>
    %48 = arith.maximumf %35, %47 : vector<48x128xf32>
    %cst_19 = arith.constant 0.000000e+00 : f32
    %49 = vector.broadcast %cst_19 : f32 to vector<48x128xf32>
    %50 = arith.maximumf %48, %49 : vector<48x128xf32>
    %51 = arith.truncf %50 : vector<48x128xf32> to vector<48x128xbf16>
    %52 = vector.shape_cast %51 : vector<48x128xbf16> to vector<2x24x128xbf16>
    %53 = vector.extract_strided_slice %52 {offsets = [0, 0, 0], sizes = [2, 16, 128], strides = [1, 1, 1]} : vector<2x24x128xbf16> to vector<2x16x128xbf16>
    %54 = vector.shape_cast %53 : vector<2x16x128xbf16> to vector<32x128xbf16>
    %c0_20 = arith.constant 0 : index
    %c0_21 = arith.constant 0 : index
    %c0_22 = arith.constant 0 : index
    %55 = vector.load %arg4[%c0_20, %c0_21, %c0_22] : memref<5x128x256xbf16, #tpu.memory_space<vmem>>, vector<1x128x256xbf16>
    %56 = vector.shape_cast %55 : vector<1x128x256xbf16> to vector<128x256xbf16>
    %cst_23 = arith.constant dense<0.000000e+00> : vector<32x256xf32>
    %57 = tpu.matmul %54, %56, %cst_23 {dimension_numbers = #tpu.dot_dimension_numbers<[1], [0], [0], [1], [0, 0, 1, 1], [], []>} : vector<32x128xbf16>, vector<128x256xbf16>, vector<32x256xf32> -> vector<32x256xf32>
    %58 = vector.extract_strided_slice %52 {offsets = [0, 2, 0], sizes = [2, 16, 128], strides = [1, 1, 1]} : vector<2x24x128xbf16> to vector<2x16x128xbf16>
    %59 = vector.shape_cast %58 : vector<2x16x128xbf16> to vector<32x128xbf16>
    %c1_24 = arith.constant 1 : index
    %c0_25 = arith.constant 0 : index
    %c0_26 = arith.constant 0 : index
    %60 = vector.load %arg4[%c1_24, %c0_25, %c0_26] : memref<5x128x256xbf16, #tpu.memory_space<vmem>>, vector<1x128x256xbf16>
    %61 = vector.shape_cast %60 : vector<1x128x256xbf16> to vector<128x256xbf16>
    %cst_27 = arith.constant dense<0.000000e+00> : vector<32x256xf32>
    %62 = tpu.matmul %59, %61, %cst_27 {dimension_numbers = #tpu.dot_dimension_numbers<[1], [0], [0], [1], [0, 0, 1, 1], [], []>} : vector<32x128xbf16>, vector<128x256xbf16>, vector<32x256xf32> -> vector<32x256xf32>
    %63 = arith.addf %57, %62 : vector<32x256xf32>
    %64 = vector.extract_strided_slice %52 {offsets = [0, 4, 0], sizes = [2, 16, 128], strides = [1, 1, 1]} : vector<2x24x128xbf16> to vector<2x16x128xbf16>
    %65 = vector.shape_cast %64 : vector<2x16x128xbf16> to vector<32x128xbf16>
    %c2_28 = arith.constant 2 : index
    %c0_29 = arith.constant 0 : index
    %c0_30 = arith.constant 0 : index
    %66 = vector.load %arg4[%c2_28, %c0_29, %c0_30] : memref<5x128x256xbf16, #tpu.memory_space<vmem>>, vector<1x128x256xbf16>
    %67 = vector.shape_cast %66 : vector<1x128x256xbf16> to vector<128x256xbf16>
    %cst_31 = arith.constant dense<0.000000e+00> : vector<32x256xf32>
    %68 = tpu.matmul %65, %67, %cst_31 {dimension_numbers = #tpu.dot_dimension_numbers<[1], [0], [0], [1], [0, 0, 1, 1], [], []>} : vector<32x128xbf16>, vector<128x256xbf16>, vector<32x256xf32> -> vector<32x256xf32>
    %69 = arith.addf %63, %68 : vector<32x256xf32>
    %70 = vector.extract_strided_slice %52 {offsets = [0, 6, 0], sizes = [2, 16, 128], strides = [1, 1, 1]} : vector<2x24x128xbf16> to vector<2x16x128xbf16>
    %71 = vector.shape_cast %70 : vector<2x16x128xbf16> to vector<32x128xbf16>
    %c3_32 = arith.constant 3 : index
    %c0_33 = arith.constant 0 : index
    %c0_34 = arith.constant 0 : index
    %72 = vector.load %arg4[%c3_32, %c0_33, %c0_34] : memref<5x128x256xbf16, #tpu.memory_space<vmem>>, vector<1x128x256xbf16>
    %73 = vector.shape_cast %72 : vector<1x128x256xbf16> to vector<128x256xbf16>
    %cst_35 = arith.constant dense<0.000000e+00> : vector<32x256xf32>
    %74 = tpu.matmul %71, %73, %cst_35 {dimension_numbers = #tpu.dot_dimension_numbers<[1], [0], [0], [1], [0, 0, 1, 1], [], []>} : vector<32x128xbf16>, vector<128x256xbf16>, vector<32x256xf32> -> vector<32x256xf32>
    %75 = arith.addf %69, %74 : vector<32x256xf32>
    %76 = vector.extract_strided_slice %52 {offsets = [0, 8, 0], sizes = [2, 16, 128], strides = [1, 1, 1]} : vector<2x24x128xbf16> to vector<2x16x128xbf16>
    %77 = vector.shape_cast %76 : vector<2x16x128xbf16> to vector<32x128xbf16>
    %c4_36 = arith.constant 4 : index
    %c0_37 = arith.constant 0 : index
    %c0_38 = arith.constant 0 : index
    %78 = vector.load %arg4[%c4_36, %c0_37, %c0_38] : memref<5x128x256xbf16, #tpu.memory_space<vmem>>, vector<1x128x256xbf16>
    %79 = vector.shape_cast %78 : vector<1x128x256xbf16> to vector<128x256xbf16>
    %cst_39 = arith.constant dense<0.000000e+00> : vector<32x256xf32>
    %80 = tpu.matmul %77, %79, %cst_39 {dimension_numbers = #tpu.dot_dimension_numbers<[1], [0], [0], [1], [0, 0, 1, 1], [], []>} : vector<32x128xbf16>, vector<128x256xbf16>, vector<32x256xf32> -> vector<32x256xf32>
    %81 = arith.addf %75, %80 : vector<32x256xf32>
    %82 = vector.extract_strided_slice %81 {offsets = [0, 0], sizes = [32, 128], strides = [1, 1]} : vector<32x256xf32> to vector<32x128xf32>
    %83 = vector.extract_strided_slice %81 {offsets = [0, 128], sizes = [32, 128], strides = [1, 1]} : vector<32x256xf32> to vector<32x128xf32>
    %84 = arith.maximumf %82, %83 : vector<32x128xf32>
    %c0_40 = arith.constant 0 : index
    %c0_41 = arith.constant 0 : index
    %85 = vector.load %arg5[%c0_40, %c0_41] : memref<1x128xf32, #tpu.memory_space<vmem>>, vector<1x128xf32>
    %86 = vector.broadcast %85 : vector<1x128xf32> to vector<32x128xf32>
    %87 = arith.addf %84, %86 : vector<32x128xf32>
    %88 = tpu.iota {dimensions = array<i32: 0>} : vector<32x128xi32>
    %c2_i32 = arith.constant 2 : i32
    %89 = vector.broadcast %c2_i32 : i32 to vector<32x128xi32>
    %90 = arith.andi %88, %89 : vector<32x128xi32>
    %c0_i32_42 = arith.constant 0 : i32
    %91 = vector.broadcast %c0_i32_42 : i32 to vector<32x128xi32>
    %92 = arith.cmpi eq, %90, %91 : vector<32x128xi32>
    %93 = vector.extract_strided_slice %87 {offsets = [2, 0], sizes = [30, 128], strides = [1, 1]} : vector<32x128xf32> to vector<30x128xf32>
    %94 = vector.extract_strided_slice %87 {offsets = [30, 0], sizes = [2, 128], strides = [1, 1]} : vector<32x128xf32> to vector<2x128xf32>
    %95 = tpu.concatenate %93, %94 in 0 : vector<30x128xf32>, vector<2x128xf32> -> vector<32x128xf32>
    %96 = vector.extract_strided_slice %87 {offsets = [0, 0], sizes = [2, 128], strides = [1, 1]} : vector<32x128xf32> to vector<2x128xf32>
    %97 = vector.extract_strided_slice %87 {offsets = [0, 0], sizes = [30, 128], strides = [1, 1]} : vector<32x128xf32> to vector<30x128xf32>
    %98 = tpu.concatenate %96, %97 in 0 : vector<2x128xf32>, vector<30x128xf32> -> vector<32x128xf32>
    %99 = arith.select %92, %95, %98 : vector<32x128xi1>, vector<32x128xf32>
    %100 = arith.maximumf %87, %99 : vector<32x128xf32>
    %cst_43 = arith.constant 0.000000e+00 : f32
    %101 = vector.broadcast %cst_43 : f32 to vector<32x128xf32>
    %102 = arith.maximumf %100, %101 : vector<32x128xf32>
    %103 = arith.truncf %102 : vector<32x128xf32> to vector<32x128xbf16>
    %104 = vector.shape_cast %103 : vector<32x128xbf16> to vector<2x16x128xbf16>
    %c0_44 = arith.constant 0 : index
    %c0_45 = arith.constant 0 : index
    %105 = vector.load %arg7[%c0_44, %c0_45] : memref<1x128xf32, #tpu.memory_space<vmem>>, vector<1x128xf32>
    %106 = vector.extract_strided_slice %104 {offsets = [0, 0, 0], sizes = [2, 1, 128], strides = [1, 1, 1]} : vector<2x16x128xbf16> to vector<2x1x128xbf16>
    %107 = vector.shape_cast %106 : vector<2x1x128xbf16> to vector<2x128xbf16>
    %c0_46 = arith.constant 0 : index
    %c0_47 = arith.constant 0 : index
    %c0_48 = arith.constant 0 : index
    %108 = vector.load %arg6[%c0_46, %c0_47, %c0_48] : memref<4x128x128xbf16, #tpu.memory_space<vmem>>, vector<1x128x128xbf16>
    %109 = vector.shape_cast %108 : vector<1x128x128xbf16> to vector<128x128xbf16>
    %cst_49 = arith.constant dense<0.000000e+00> : vector<2x128xf32>
    %110 = tpu.matmul %107, %109, %cst_49 {dimension_numbers = #tpu.dot_dimension_numbers<[1], [0], [0], [1], [0, 0, 1, 1], [], []>} : vector<2x128xbf16>, vector<128x128xbf16>, vector<2x128xf32> -> vector<2x128xf32>
    %111 = vector.broadcast %105 : vector<1x128xf32> to vector<2x128xf32>
    %112 = arith.addf %111, %110 : vector<2x128xf32>
    %113 = vector.extract_strided_slice %104 {offsets = [0, 4, 0], sizes = [2, 1, 128], strides = [1, 1, 1]} : vector<2x16x128xbf16> to vector<2x1x128xbf16>
    %114 = vector.shape_cast %113 : vector<2x1x128xbf16> to vector<2x128xbf16>
    %c1_50 = arith.constant 1 : index
    %c0_51 = arith.constant 0 : index
    %c0_52 = arith.constant 0 : index
    %115 = vector.load %arg6[%c1_50, %c0_51, %c0_52] : memref<4x128x128xbf16, #tpu.memory_space<vmem>>, vector<1x128x128xbf16>
    %116 = vector.shape_cast %115 : vector<1x128x128xbf16> to vector<128x128xbf16>
    %cst_53 = arith.constant dense<0.000000e+00> : vector<2x128xf32>
    %117 = tpu.matmul %114, %116, %cst_53 {dimension_numbers = #tpu.dot_dimension_numbers<[1], [0], [0], [1], [0, 0, 1, 1], [], []>} : vector<2x128xbf16>, vector<128x128xbf16>, vector<2x128xf32> -> vector<2x128xf32>
    %118 = arith.addf %112, %117 : vector<2x128xf32>
    %119 = vector.extract_strided_slice %104 {offsets = [0, 8, 0], sizes = [2, 1, 128], strides = [1, 1, 1]} : vector<2x16x128xbf16> to vector<2x1x128xbf16>
    %120 = vector.shape_cast %119 : vector<2x1x128xbf16> to vector<2x128xbf16>
    %c2_54 = arith.constant 2 : index
    %c0_55 = arith.constant 0 : index
    %c0_56 = arith.constant 0 : index
    %121 = vector.load %arg6[%c2_54, %c0_55, %c0_56] : memref<4x128x128xbf16, #tpu.memory_space<vmem>>, vector<1x128x128xbf16>
    %122 = vector.shape_cast %121 : vector<1x128x128xbf16> to vector<128x128xbf16>
    %cst_57 = arith.constant dense<0.000000e+00> : vector<2x128xf32>
    %123 = tpu.matmul %120, %122, %cst_57 {dimension_numbers = #tpu.dot_dimension_numbers<[1], [0], [0], [1], [0, 0, 1, 1], [], []>} : vector<2x128xbf16>, vector<128x128xbf16>, vector<2x128xf32> -> vector<2x128xf32>
    %124 = arith.addf %118, %123 : vector<2x128xf32>
    %125 = vector.extract_strided_slice %104 {offsets = [0, 12, 0], sizes = [2, 1, 128], strides = [1, 1, 1]} : vector<2x16x128xbf16> to vector<2x1x128xbf16>
    %126 = vector.shape_cast %125 : vector<2x1x128xbf16> to vector<2x128xbf16>
    %c3_58 = arith.constant 3 : index
    %c0_59 = arith.constant 0 : index
    %c0_60 = arith.constant 0 : index
    %127 = vector.load %arg6[%c3_58, %c0_59, %c0_60] : memref<4x128x128xbf16, #tpu.memory_space<vmem>>, vector<1x128x128xbf16>
    %128 = vector.shape_cast %127 : vector<1x128x128xbf16> to vector<128x128xbf16>
    %cst_61 = arith.constant dense<0.000000e+00> : vector<2x128xf32>
    %129 = tpu.matmul %126, %128, %cst_61 {dimension_numbers = #tpu.dot_dimension_numbers<[1], [0], [0], [1], [0, 0, 1, 1], [], []>} : vector<2x128xbf16>, vector<128x128xbf16>, vector<2x128xf32> -> vector<2x128xf32>
    %130 = arith.addf %124, %129 : vector<2x128xf32>
    %cst_62 = arith.constant 0.000000e+00 : f32
    %131 = vector.broadcast %cst_62 : f32 to vector<2x128xf32>
    %132 = arith.maximumf %130, %131 : vector<2x128xf32>
    %133 = arith.truncf %132 : vector<2x128xf32> to vector<2x128xbf16>
    %c0_63 = arith.constant 0 : index
    %c0_64 = arith.constant 0 : index
    %134 = vector.load %arg8[%c0_63, %c0_64] : memref<128x128xbf16, #tpu.memory_space<vmem>>, vector<128x128xbf16>
    %cst_65 = arith.constant dense<0.000000e+00> : vector<2x128xf32>
    %135 = tpu.matmul %133, %134, %cst_65 {dimension_numbers = #tpu.dot_dimension_numbers<[1], [0], [0], [1], [0, 0, 1, 1], [], []>} : vector<2x128xbf16>, vector<128x128xbf16>, vector<2x128xf32> -> vector<2x128xf32>
    %c0_66 = arith.constant 0 : index
    %c0_67 = arith.constant 0 : index
    %136 = vector.load %arg9[%c0_66, %c0_67] : memref<1x128xf32, #tpu.memory_space<vmem>>, vector<1x128xf32>
    %137 = vector.broadcast %136 : vector<1x128xf32> to vector<2x128xf32>
    %138 = arith.addf %135, %137 : vector<2x128xf32>
    %139 = tpu.iota {dimensions = array<i32: 1>} : vector<2x128xi32>
    %c10_i32 = arith.constant 10 : i32
    %140 = vector.broadcast %c10_i32 : i32 to vector<2x128xi32>
    %141 = arith.cmpi slt, %139, %140 : vector<2x128xi32>
    %cst_68 = arith.constant -1.000000e+30 : f32
    %142 = vector.broadcast %cst_68 : f32 to vector<2x128xf32>
    %143 = arith.select %141, %138, %142 : vector<2x128xi1>, vector<2x128xf32>
    %cst_69 = arith.constant dense<0xFF800000> : vector<2xf32>
    %144 = vector.multi_reduction <maximumf>, %143, %cst_69 [1] : vector<2x128xf32> to vector<2xf32>
    %145 = vector.shape_cast %144 : vector<2xf32> to vector<2x1xf32>
    %146 = vector.broadcast %145 : vector<2x1xf32> to vector<2x128xf32>
    %147 = arith.subf %138, %146 : vector<2x128xf32>
    %148 = math.exp %147 : vector<2x128xf32>
    %cst_70 = arith.constant 0.000000e+00 : f32
    %149 = vector.broadcast %cst_70 : f32 to vector<2x128xf32>
    %150 = arith.select %141, %148, %149 : vector<2x128xi1>, vector<2x128xf32>
    %cst_71 = arith.constant dense<0.000000e+00> : vector<2xf32>
    %151 = vector.multi_reduction <add>, %150, %cst_71 [1] : vector<2x128xf32> to vector<2xf32>
    %152 = vector.shape_cast %151 : vector<2xf32> to vector<2x1xf32>
    %153 = math.log %152 : vector<2x1xf32>
    %154 = vector.broadcast %153 : vector<2x1xf32> to vector<2x128xf32>
    %155 = arith.subf %147, %154 : vector<2x128xf32>
    %c0_72 = arith.constant 0 : index
    %c0_73 = arith.constant 0 : index
    %156 = vector.load %arg10[%c0_72, %c0_73] : memref<2x128xf32, #tpu.memory_space<vmem>>, vector<2x128xf32>
    tpu.vector_store %arg10[%c0_72, %c0_73], %155 {strides = array<i32>} : memref<2x128xf32, #tpu.memory_space<vmem>>, vector<2x128xf32>,
    return
  }
  func.func @transform_0(%arg0: i32) -> (i32, i32, i32) {
    %c0_i32 = arith.constant 0 : i32
    %c0_i32_0 = arith.constant 0 : i32
    %c0_i32_1 = arith.constant 0 : i32
    return %arg0, %c0_i32, %c0_i32_0 : i32, i32, i32
  }
  func.func @transform_1(%arg0: i32) -> (i32, i32, i32) {
    %c0_i32 = arith.constant 0 : i32
    %c0_i32_0 = arith.constant 0 : i32
    %c0_i32_1 = arith.constant 0 : i32
    %c0_i32_2 = arith.constant 0 : i32
    return %c0_i32, %c0_i32_0, %c0_i32_1 : i32, i32, i32
  }
  func.func @transform_2(%arg0: i32) -> (i32, i32) {
    %c0_i32 = arith.constant 0 : i32
    %c0_i32_0 = arith.constant 0 : i32
    %c0_i32_1 = arith.constant 0 : i32
    return %c0_i32, %c0_i32_0 : i32, i32
  }
  func.func @transform_3(%arg0: i32) -> (i32, i32, i32) {
    %c0_i32 = arith.constant 0 : i32
    %c0_i32_0 = arith.constant 0 : i32
    %c0_i32_1 = arith.constant 0 : i32
    %c0_i32_2 = arith.constant 0 : i32
    return %c0_i32, %c0_i32_0, %c0_i32_1 : i32, i32, i32
  }
  func.func @transform_4(%arg0: i32) -> (i32, i32) {
    %c0_i32 = arith.constant 0 : i32
    %c0_i32_0 = arith.constant 0 : i32
    %c0_i32_1 = arith.constant 0 : i32
    return %c0_i32, %c0_i32_0 : i32, i32
  }
  func.func @transform_5(%arg0: i32) -> (i32, i32, i32) {
    %c0_i32 = arith.constant 0 : i32
    %c0_i32_0 = arith.constant 0 : i32
    %c0_i32_1 = arith.constant 0 : i32
    %c0_i32_2 = arith.constant 0 : i32
    return %c0_i32, %c0_i32_0, %c0_i32_1 : i32, i32, i32
  }
  func.func @transform_6(%arg0: i32) -> (i32, i32) {
    %c0_i32 = arith.constant 0 : i32
    %c0_i32_0 = arith.constant 0 : i32
    %c0_i32_1 = arith.constant 0 : i32
    return %c0_i32, %c0_i32_0 : i32, i32
  }
  func.func @transform_7(%arg0: i32) -> (i32, i32) {
    %c0_i32 = arith.constant 0 : i32
    %c0_i32_0 = arith.constant 0 : i32
    %c0_i32_1 = arith.constant 0 : i32
    return %c0_i32, %c0_i32_0 : i32, i32
  }
  func.func @transform_8(%arg0: i32) -> (i32, i32) {
    %c0_i32 = arith.constant 0 : i32
    %c0_i32_0 = arith.constant 0 : i32
    %c0_i32_1 = arith.constant 0 : i32
    return %c0_i32, %c0_i32_0 : i32, i32
  }
  func.func @transform_9(%arg0: i32) -> (i32, i32) {
    %c0_i32 = arith.constant 0 : i32
    %c0_i32_0 = arith.constant 0 : i32
    return %arg0, %c0_i32 : i32, i32
  }
}

</mosaic_0001>

<bundles_post_ra>
// kernel: net_forward.1
= control target key start
LH: loop header
LB: loop body
LE: loop exit
PB: predicated region body
PF: predicated region fallthrough
CT: control target
= control target key end

     0   :  { %14 = vsyncpa [#allocation3], 0  ;;  %s4234_s0 = inlined_call_operand.vmem [shape: bf16[2,28,84], index: 0, kind: input, shape index: {}]   ;;  %s4235_s1 = inlined_call_operand.vmem [shape: bf16[5,84,256], index: 1, kind: input, shape index: {}]   ;;  %s4236_s2 = inlined_call_operand.vmem [shape: f32[1,128], index: 2, kind: input, shape index: {}]   ;;  %s4237_s3 = inlined_call_operand.hbm [shape: bf16[5,128,256], index: 3, kind: input, shape index: {}]   ;;  %s4238_s4 = inlined_call_operand.vmem [shape: f32[1,128], index: 4, kind: input, shape index: {}]   ;;  %s4239_s5 = inlined_call_operand.hbm [shape: bf16[4,128,128], index: 5, kind: input, shape index: {}]   ;;  %s4240_s6 = inlined_call_operand.vmem [shape: f32[1,128], index: 6, kind: input, shape index: {}]   ;;  %s4241_s7 = inlined_call_operand.vmem [shape: bf16[128,128], index: 7, kind: input, shape index: {}]   ;;  %s4242_s8 = inlined_call_operand.vmem [shape: f32[1,128], index: 8, kind: input, shape index: {}]   ;;  %s4243_s9 = inlined_call_operand.hbm [shape: f32[2,128], index: 9, kind: output, shape index: {}]  }
   0x1   :  { %15 = vsyncpa [#allocation6], 0 }
   0x2   :  { %16 = vsyncpa [#allocation4], 0  ;;  %s3445_s30 = smov [#allocation2]  }
   0x3   :  { %s28_s10 = sshll.u32 %s3445_s30, 4  ;;  %s29_s10 = int_to_ptr.vmem [resolvable:$true] %s28_s10 }
   0x4   :  { %s3387_s11 = scalar_lea.vmem %s29_s10, 10240  ;;  %p3392_p1 = scmp.lt.s32.totalorder %s29_s10, %s29_s10 }
   0x5   :  { %p3388_p0 = scmp.ne.s32.totalorder %s29_s10, %s3387_s11  ;;  %p3393_p2 = scmp.lt.s32.totalorder %s3387_s11, %s3387_s11 }
   0x7   :  { %p3394_p3 = por %p3393_p2, %p3392_p1 }
   0x9   :  { %p3395_p4 = pnand %p3394_p3, %p3388_p0 }
   0xb   :  { %3398 = shalt.err (!%p3395_p4)
}
   0xc   :  { %s3446_s12 = smov 128   ;;  %s3447_s13 = smov 8  }
   0xd   :  { %34 = dma.hbm_to_vmem [thread:$0]  %s4237_s3, 10240, %s29_s10, [#allocation3], %s3446_s12, %s3446_s12, %s3447_s13  }
   0xe   :  { %s3448_s16 = smov [#allocation5]  }
   0xf   :  { %s42_s17 = sshll.u32 %s3448_s16, 4  ;;  %s43_s17 = int_to_ptr.vmem [resolvable:$true] %s42_s17 }
  0x10   :  { %s3407_s18 = scalar_lea.vmem %s43_s17, 4096  ;;  %p3412_p6 = scmp.lt.s32.totalorder %s43_s17, %s43_s17 }
  0x11   :  { %p3408_p5 = scmp.ne.s32.totalorder %s43_s17, %s3407_s18  ;;  %p3413_p7 = scmp.lt.s32.totalorder %s3407_s18, %s3407_s18 }
  0x13   :  { %p3414_p8 = por %p3413_p7, %p3412_p6 }
  0x15   :  { %p3415_p9 = pnand %p3414_p8, %p3408_p5 }
  0x17   :  { %3418 = shalt.err (!%p3415_p9)
}
  0x18   :  { %s3449_s19 = smov 64   ;;  %s3450_s20 = smov 4  }
  0x19   :  { %48 = dma.hbm_to_vmem [thread:$0]  %s4239_s5, 4096, %s43_s17, [#allocation6], %s3449_s19, %s3449_s19, %s3450_s20  }
  0x1a   :  { %3439 = dma.done.wait [#allocation3], 10240  }
  0x1b   :  { %3440 = vsyncadd [#allocation3], 4294957056 }
  0x1c   :  { %3441 = dma.done.wait [#allocation6], 4096  }
  0x1d   :  { %3442 = vsyncadd [#allocation6], 4294963200  ;;  %v3451_v0 = vmov 0   ;;  %v2691_v1 = vld [vmem:[%s4235_s1 + $0xa8] sm:$0x33]  ;;  %vm238_vm0 = vcmask 1041408  }
  0x1e   :  { %277 = vmatprep.mubr.bf16.mxu0 %v3451_v0  ;;  %425 = vmatprep.mubr.bf16.mxu1 %v3451_v0  ;;  %v80_v2 = vld [vmem:[%s4235_s1 + $0x50] sm:$0x33]  ;;  %v2706_v3 = vcombine.high %v2691_v1, %v2691_v1  ;;  %v2705_v5 = vcombine.low %v2691_v1, %v2691_v1  ;;  %v3131_v7 = vld [vmem:[%s4235_s1 + $0x9c] ss:$8 sps:$4 sm:$0xff]   ;;  %v3135_v11 = vld [vmem:[%s4235_s1 + $0x98] ss:$8 sps:$4 sm:$0xff]  }
  0x1f   :  { %v2725_v4 = vcombine.high %v80_v2, %v80_v2  ;;  %v2724_v6 = vcombine.low %v80_v2, %v80_v2  ;;  %v3133_v8 = vld [vmem:[%s4235_s1 + $0x44] ss:$8 sps:$4 sm:$0xff]   ;;  %v3136_v12 = vld [vmem:[%s4235_s1 + $0x40] ss:$8 sps:$4 sm:$0xff]   ;;  %v3139_v14 = vld [vmem:[%s4235_s1 + $0x34] ss:$8 sps:$4 sm:$0xff]  }
  0x20   :  { %2707 = vmatprep.subr.msk.bf16.mxu0 %vm238_vm0, %v2706_v3  ;;  %v240_v9 = vsel %vm238_vm0, %v2705_v5, 0  ;;  %v3137_v13 = vld [vmem:[%s4235_s1 + $0x8c] ss:$8 sps:$4 sm:$0xff]   ;;  %v3141_v15 = vld [vmem:[%s4235_s1 + $0x88] ss:$8 sps:$4 sm:$0xff]   ;;  %vm228_vm4 = vcmask 687104  }
  0x21   :  { %2726 = vmatprep.subr.msk.bf16.mxu1 %vm238_vm0, %v2725_v4  ;;  %v388_v10 = vsel %vm238_vm0, %v2724_v6, 0  ;;  %250 = vmatpush1.bf16.msra.mxu0 %v240_v9  ;;  %v3142_v16 = vld [vmem:[%s4235_s1 + $0x30] ss:$8 sps:$4 sm:$0xff]   ;;  %v3143_v17 = vld [vmem:[%s4235_s1 + $0x7c] ss:$8 sps:$4 sm:$0xff]   ;;  %vm458_vm5 = vcmask 1042432  }
  0x22   :  { %398 = vmatpush1.bf16.msra.mxu1 %v388_v10  ;;  %251 = vmatprep.subr.bf16.mxu0 %v3131_v7  ;;  %v3145_v18 = vld [vmem:[%s4235_s1 + $0x24] ss:$8 sps:$4 sm:$0xff]   ;;  %v3147_v19 = vld [vmem:[%s4235_s1 + $0x78] ss:$8 sps:$4 sm:$0xff]   ;;  %vm81_vm1 = vsmask.f32 3328 }
  0x23   :  { %399 = vmatprep.subr.bf16.mxu1 %v3133_v8  ;;  %v3148_v20 = vld [vmem:[%s4235_s1 + $0x20] ss:$8 sps:$4 sm:$0xff]   ;;  %v3149_v21 = vld [vmem:[%s4235_s1 + $0x6c] ss:$8 sps:$4 sm:$0xff]   ;;  %vm82_vm2 = vsmask.f32 7440 }
  0x24   :  { %v3151_v22 = vld [vmem:[%s4235_s1 + $0x14] ss:$8 sps:$4 sm:$0xff]   ;;  %v3153_v23 = vld [vmem:[%s4235_s1 + $0x68] ss:$8 sps:$4 sm:$0xff]   ;;  %v3574_v25 = vld [vmem:[%s4234_s0] sm:$0xf] }
  0x25   :  { %252 = vmatpush1.bf16.msra.mxu0 %v3135_v11  ;;  %v3154_v24 = vld [vmem:[%s4235_s1 + $0x10] ss:$8 sps:$4 sm:$0xff]   ;;  %v3579_v26 = vld [vmem:[%s4234_s0 + $0x4] sm:$0xf]  ;;  %v3584_v27 = vld [vmem:[%s4234_s0 + $0x8] sm:$0xf] }
  0x26   :  { %400 = vmatpush1.bf16.msra.mxu1 %v3136_v12  ;;  %253 = vmatprep.subr.bf16.mxu0 %v3137_v13  ;;  %v3155_v28 = vld [vmem:[%s4235_s1 + $0x5c] ss:$8 sps:$4 sm:$0xff]   ;;  %v85_v29 = vshrl.u32 %v3574_v25, 16  ;;  %v88_v30 = vshll.u32 %v3574_v25, 16  ;;  %v94_v31 = vshll.u32 %v3579_v26, 16  ;;  %v98_v32 = vshrl.u32 %v3579_v26, 16  ;;  %vm3608_vm3 = vmor %vm81_vm1, %vm82_vm2 }
  0x27   :  { %401 = vmatprep.subr.bf16.mxu1 %v3139_v14  ;;  %v3157_v33 = vld [vmem:[%s4235_s1 + $0x4] ss:$8 sps:$4 sm:$0xff]   ;;  %v104_v34 = vshll.u32 %v3584_v27, 16  ;;  %v2772_v41 = vld [vmem:[%s4235_s1 + $0x158] sm:$0x33]  ;;  %v108_v56 = vshrl.u32 %v3584_v27, 16  ;;  %v2711_v60 = vcombine.low %v3574_v25, %v3579_v26 }
  0x28   :  { %v87_v35 = vrot.slane %v85_v29, 4  ;;  %v90_v36 = vrot.slane %v88_v30, 5  ;;  %v96_v37 = vrot.slane %v94_v31, 5  ;;  %v100_v38 = vrot.slane %v98_v32, 4  ;;  %v2742_v39 = vld [vmem:[%s4235_s1 + $0x100] sm:$0x33] }
  0x29   :  { %254 = vmatpush1.bf16.msra.mxu0 %v3141_v15  ;;  %v3159_v42 = vld [vmem:[%s4235_s1 + $0x58] ss:$8 sps:$4 sm:$0xff]   ;;  %v106_v45 = vrot.slane %v104_v34, 5  ;;  %v2757_v47 = vcombine.high %v2742_v39, %v2742_v39  ;;  %v2756_v48 = vcombine.low %v2742_v39, %v2742_v39  ;;  %v3626_v49 = vld [vmem:[%s4234_s0 + $0xc] sm:$0x3]  ;;  %v2787_v52 = vcombine.high %v2772_v41, %v2772_v41 }
  0x2a   :  { %402 = vmatpush1.bf16.msra.mxu1 %v3142_v16  ;;  %255 = vmatprep.subr.bf16.mxu0 %v3143_v17  ;;  %v91_v43 = vor.u32 %v90_v36, %v87_v35  ;;  %v101_v44 = vor.u32 %v100_v38, %v96_v37  ;;  %v3160_v46 = vld [vmem:[%s4235_s1] ss:$8 sps:$4 sm:$0xff]   ;;  %v2786_v53 = vcombine.low %v2772_v41, %v2772_v41  ;;  %v3631_v54 = vld [vmem:[%s4234_s0 + $0x10] sm:$0xf]  ;;  %v3636_v55 = vld [vmem:[%s4234_s0 + $0x14] sm:$0xf] }
  0x2b   :  { %403 = vmatprep.subr.bf16.mxu1 %v3145_v18  ;;  %v114_v57 = vshll.u32 %v3626_v49, 16  ;;  %v119_v61 = vshrl.u32 %v3631_v54, 16  ;;  %v567_v63 = vsel %vm238_vm0, %v2756_v48, 0  ;;  %v3168_v1 = vld [vmem:[%s4235_s1 + $0xf4] ss:$8 sps:$4 sm:$0xff]   ;;  %v110_v2 = vrot.slane %v108_v56, 4 }
  0x2c   :  { %v92_v50 = vrot.slane %v91_v43, 4  ;;  %v102_v51 = vrot.slane %v101_v44, 4  ;;  %v122_v3 = vshll.u32 %v3631_v54, 16  ;;  %vm459_vm6 = vcmask 1046532   ;;  %v3171_v5 = vld [vmem:[%s4235_s1 + $0x14c] ss:$8 sps:$4 sm:$0xff]  }
  0x2d   :  { %256 = vmatpush1.bf16.msra.mxu0 %v3147_v19  ;;  %v776_v4 = vsel %vm238_vm0, %v2786_v53, 0  ;;  %v121_v6 = vrot.slane %v119_v61, 4  ;;  %v128_v7 = vshll.u32 %v3636_v55, 16  ;;  %v3663_v8 = vrot.slane %v85_v29, 5  ;;  %v3166_v9 = vld [vmem:[%s4235_s1 + $0xf0] ss:$8 sps:$4 sm:$0xff]   ;;  %vm3744_vm8 = vmor %vm458_vm5, %vm459_vm6 }
  0x2e   :  { %404 = vmatpush1.bf16.msra.mxu1 %v3148_v20  ;;  %257 = vmatprep.subr.bf16.mxu0 %v3149_v21  ;;  %v97_v58 = vsel %vm3608_vm3, %v92_v50, %v96_v37  ;;  %v107_v59 = vsel %vm3608_vm3, %v102_v51, %v106_v45  ;;  %v3169_v10 = vld [vmem:[%s4235_s1 + $0x148] ss:$8 sps:$4 sm:$0xff]   ;;  %v111_v11 = vor.u32 %v110_v2, %v106_v45  ;;  %v116_v12 = vrot.slane %v114_v57, 5  ;;  %v3175_v15 = vld [vmem:[%s4235_s1 + $0xe4] ss:$8 sps:$4 sm:$0xff]  }
  0x2f   :  { %405 = vmatprep.subr.bf16.mxu1 %v3151_v22  ;;  %v2692_v62 = vcombine.low %v97_v58, %v107_v59  ;;  %v124_v13 = vrot.slane %v122_v3, 5  ;;  %v651_v14 = vrot.slane %v88_v30, 6  ;;  %v3178_v16 = vld [vmem:[%s4235_s1 + $0x13c] ss:$8 sps:$4 sm:$0xff]   ;;  %v132_v17 = vshrl.u32 %v3636_v55, 16 }
  0x30   :  { %v654_v18 = vrot.slane %v98_v32, 5  ;;  %v112_v19 = vrot.slane %v111_v11, 4  ;;  %v130_v21 = vrot.slane %v128_v7, 5  ;;  %v3693_v22 = vld [vmem:[%s4234_s0 + $0x18] sm:$0xf]  ;;  %v655_v30 = vrot.slane %v94_v31, 6 }
  0x31   :  { %258 = vmatpush1.bf16.msra.mxu0 %v3153_v23  ;;  %v125_v20 = vor.u32 %v124_v13, %v121_v6  ;;  %v3698_v23 = vld [vmem:[%s4234_s0 + $0x1c] sm:$0x3]  ;;  %v142_v29 = vshrl.u32 %v3693_v22, 16  ;;  %v3173_v35 = vld [vmem:[%s4235_s1 + $0xe0] ss:$8 sps:$4 sm:$0xff]   ;;  %v2712_v37 = vcombine.low %v3584_v27, %v3631_v54  ;;  %v652_v50 = vor.u32 %v651_v14, %v3663_v8 }
  0x32   :  { %406 = vmatpush1.bf16.msra.mxu1 %v3154_v24  ;;  %259 = vmatprep.subr.bf16.mxu0 %v3155_v28  ;;  %v134_v24 = vrot.slane %v132_v17, 4  ;;  %v138_v28 = vshll.u32 %v3693_v22, 16  ;;  %v117_v32 = vsel %vm3608_vm3, %v112_v19, %v116_v12  ;;  %v148_v36 = vshll.u32 %v3698_v23, 16  ;;  %v3176_v31 = vld [vmem:[%s4235_s1 + $0x138] ss:$8 sps:$4 sm:$0xff]  }
  0x33   :  { %407 = vmatprep.subr.bf16.mxu1 %v3157_v33  ;;  %v126_v33 = vrot.slane %v125_v20, 4  ;;  %v144_v41 = vrot.slane %v142_v29, 4  ;;  %v3181_v43 = vld [vmem:[%s4235_s1 + $0xd4] ss:$8 sps:$4 sm:$0xff]   ;;  %vm647_vm7 = vsmask.f32 2304  ;;  %v3734_v51 = vor.u32 %v655_v30, %v654_v18 }
  0x34   :  { %v135_v38 = vor.u32 %v134_v24, %v130_v21  ;;  %v140_v39 = vrot.slane %v138_v28, 5  ;;  %v3184_v45 = vld [vmem:[%s4235_s1 + $0x12c] ss:$8 sps:$4 sm:$0xff]   ;;  %v150_v48 = vrot.slane %v148_v36, 5  ;;  %v659_v53 = vrot.slane %v108_v56, 5 }
  0x35   :  { %260 = vmatpush1.bf16.msra.mxu0 %v3159_v42  ;;  %v131_v42 = vsel %vm3608_vm3, %v126_v33, %v130_v21  ;;  %vm648_vm9 = vsmask.f32 6416  ;;  %v3182_v56 = vld [vmem:[%s4235_s1 + $0x128] ss:$8 sps:$4 sm:$0xff]   ;;  %v3191_v2 = vld [vmem:[%s4235_s1 + $0x11c] ss:$8 sps:$4 sm:$0xff]   ;;  %v2713_v40 = vcombine.low %v3636_v55, %v3693_v22 }
  0x36   :  { %408 = vmatpush1.bf16.msra.mxu1 %v3160_v46  ;;  %2758 = vmatprep.subr.msk.bf16.mxu0 %vm238_vm0, %v2757_v47  ;;  %v2693_v44 = vcombine.low %v117_v32, %v131_v42  ;;  %v136_v46 = vrot.slane %v135_v38, 4  ;;  %v145_v47 = vor.u32 %v144_v41, %v140_v39  ;;  %v3186_v8 = vld [vmem:[%s4235_s1 + $0xc0] ss:$8 sps:$4 sm:$0xff]   ;;  %v2730_v11 = vrot.slane %v3574_v25, 9  ;;  %vm3782_vm10 = vmor %vm647_vm7, %vm648_vm9  ;;  %v3194_v19 = vld [vmem:[%s4235_s1 + $0xb4] ss:$8 sps:$4 sm:$0xff]  }
  0x37   :  { %2788 = vmatprep.subr.msk.bf16.mxu1 %vm238_vm0, %v2787_v52  ;;  %v660_v52 = vrot.slane %v104_v34, 6  ;;  %v3179_v34 = vld [vmem:[%s4235_s1 + $0xd0] ss:$8 sps:$4 sm:$0xff]   ;;  %v466_v12 = vrot.slane %v3584_v27, 5  ;;  %v664_v14 = vshrl.u32 %v3626_v49, 16  ;;  %v671_v18 = vrot.slane %v122_v3, 6 }
  0x38   :  { %2708 = vmatmul.mubr.msk.bf16.vlgmr.msra.gmra.mxu0 %vm228_vm4, %v2692_v62  ;;  %v146_v58 = vrot.slane %v145_v47, 4  ;;  %v463_v62 = vrot.slane %v3579_v26, 5  ;;  %v3197_v20 = vld [vmem:[%s4235_s1 + $0x10c] ss:$8 sps:$4 sm:$0xff]   ;;  %v3192_v3 = vld [vmem:[%s4235_s1 + $0xb0] ss:$8 sps:$4 sm:$0xff]  }
  0x39   :  { %2727 = vmatmul.mubr.msk.bf16.vlgmr.msra.gmra.mxu1 %vm228_vm4, %v2711_v60  ;;  %577 = vmatpush1.bf16.msra.mxu0 %v567_v63  ;;  %v141_v60 = vsel %vm3608_vm3, %v136_v46, %v140_v39  ;;  %v3766_v6 = vor.u32 %v660_v52, %v659_v53  ;;  %v2804_v21 = vld [vmem:[%s4235_s1 + $0x1b0] sm:$0x33]  ;;  %v666_v33 = vrot.slane %v664_v14, 5  ;;  %v674_v38 = vrot.slane %v132_v17, 5 }
  0x3a   :  { %786 = vmatpush1.bf16.msra.mxu1 %v776_v4  ;;  %578 = vmatprep.subr.bf16.mxu0 %v3168_v1  ;;  %v151_v63 = vsel %vm3608_vm3, %v146_v58, %v150_v48  ;;  %v3188_v1 = vld [vmem:[%s4235_s1 + $0xc4] ss:$8 sps:$4 sm:$0xff]   ;;  %v653_v4 = vrot.slane %v652_v50, 4  ;;  %v3195_v24 = vld [vmem:[%s4235_s1 + $0x108] ss:$8 sps:$4 sm:$0xff]   ;;  %v464_v30 = vsel %vm3744_vm8, %v2730_v11, %v463_v62  ;;  %v675_v39 = vrot.slane %v128_v7, 6 }
  0x3b   :  { %787 = vmatprep.subr.bf16.mxu1 %v3171_v5  ;;  %287 = vmatprep.mubr.bf16.mxu0 %v3451_v0  ;;  %v658_v5 = vrot.slane %v3734_v51, 4  ;;  %v2819_v41 = vcombine.high %v2804_v21, %v2804_v21  ;;  %v2818_v42 = vcombine.low %v2804_v21, %v2804_v21  ;;  %v473_v46 = vrot.slane %v3636_v55, 5  ;;  %v3296_v59 = vld [vmem:[#allocation2 + $0x130] ss:$8 sps:$4 sm:$0xff]  }
  0x3c   :  { %435 = vmatprep.mubr.bf16.mxu1 %v3451_v0  ;;  %v663_v47 = vrot.slane %v3766_v6, 4  ;;  %v679_v48 = vrot.slane %v142_v29, 5  ;;  %v680_v52 = vrot.slane %v138_v28, 6  ;;  %v684_v53 = vshrl.u32 %v3698_v23, 16  ;;  %v3200_v29 = vld [vmem:[%s4235_s1 + $0x1a0] ss:$8 sps:$4 sm:$0xff]  }
  0x3d   :  { %579 = vmatpush1.bf16.msra.mxu0 %v3166_v9  ;;  %v2694_v9 = vcombine.low %v141_v60, %v151_v63  ;;  %v662_v32 = vsel %vm3782_vm10, %v658_v5, %v3766_v6  ;;  %v965_v58 = vsel %vm238_vm0, %v2818_v42, 0  ;;  %v3205_v60 = vld [vmem:[%s4235_s1 + $0x194] ss:$8 sps:$4 sm:$0xff]   ;;  %v476_v63 = vrot.slane %v3693_v22, 5  ;;  %v3203_v6 = vld [vmem:[%s4235_s1 + $0x190] ss:$8 sps:$4 sm:$0xff]  }
  0x3e   :  { %788 = vmatpush1.bf16.msra.mxu1 %v3169_v10  ;;  %580 = vmatprep.subr.bf16.mxu0 %v3175_v15  ;;  %v3189_v10 = vld [vmem:[%s4235_s1 + $0x118] ss:$8 sps:$4 sm:$0xff]   ;;  %v465_v15 = vrot.slane %v463_v62, 4  ;;  %v687_v5 = vrot.slane %v148_v36, 6  ;;  %vm857_vm11 = vcmask 1045508   ;;  %v479_v11 = vrot.slane %v3698_v23, 5 }
  0x3f   :  { %789 = vmatprep.subr.bf16.mxu1 %v3178_v16  ;;  %v670_v16 = vrot.slane %v119_v61, 5  ;;  %v657_v61 = vsel %vm3782_vm10, %v653_v4, %v3734_v51  ;;  %v676_v51 = vor.u32 %v675_v39, %v674_v38  ;;  %v686_v4 = vrot.slane %v684_v53, 5  ;;  %vm3869_vm12 = vmor %vm238_vm0, %vm857_vm11  ;;  %v3226_v53 = vld [vmem:[#allocation2 + $0xf4] ss:$8 sps:$4 sm:$0xff]  }
  0x40   :  { %2709 = vmatmul.mubr.msk.bf16.gmra.mxu0 %vm228_vm4, %v2693_v44  ;;  %v469_v44 = vrot.slane %v3626_v49, 5  ;;  %v874_v38 = vrot.slane %v3693_v22, 6  ;;  %v867_v39 = vrot.slane %v3626_v49, 6  ;;  %v2793_v22 = vrot.slane %v3631_v54, 10 }
  0x41   :  { %2728 = vmatmul.mubr.msk.bf16.gmra.mxu1 %vm228_vm4, %v2712_v37  ;;  %581 = vmatpush1.bf16.msra.mxu0 %v3173_v35  ;;  %v667_v35 = vrot.slane %v114_v57, 6  ;;  %v467_v37 = vsel %vm3744_vm8, %v465_v15, %v466_v12  ;;  %v2773_v57 = vcombine.low %v657_v61, %v662_v32  ;;  %v678_v36 = vrot.slane %v676_v51, 4 }
  0x42   :  { %790 = vmatpush1.bf16.msra.mxu1 %v3176_v31  ;;  %582 = vmatprep.subr.bf16.mxu0 %v3181_v43  ;;  %v672_v31 = vor.u32 %v671_v18, %v670_v16  ;;  %v468_v43 = vrot.slane %v466_v12, 4  ;;  %v2743_v17 = vcombine.low %v464_v30, %v467_v37  ;;  %v478_v12 = vrot.slane %v476_v63, 4  ;;  %v3206_v18 = vld [vmem:[%s4235_s1 + $0x180] ss:$8 sps:$4 sm:$0xff]   ;;  %v3209_v30 = vld [vmem:[%s4235_s1 + $0x170] ss:$8 sps:$4 sm:$0xff]  }
  0x43   :  { %791 = vmatprep.subr.bf16.mxu1 %v3184_v45  ;;  %297 = vmatprep.mubr.bf16.mxu0 %v3451_v0  ;;  %v2731_v45 = vrot.slane %v3631_v54, 9  ;;  %v668_v7 = vor.u32 %v667_v35, %v666_v33  ;;  %v688_v15 = vor.u32 %v687_v5, %v686_v4  ;;  %v3214_v35 = vld [vmem:[%s4235_s1 + $0x164] ss:$8 sps:$4 sm:$0xff]   ;;  %v2792_v37 = vrot.slane %v3574_v25, 10  ;;  %v3239_v4 = vld [vmem:[#allocation2 + $0x20] ss:$8 sps:$4 sm:$0xff]  }
  0x44   :  { %445 = vmatprep.mubr.bf16.mxu1 %v3451_v0  ;;  %v673_v50 = vrot.slane %v672_v31, 4  ;;  %v470_v28 = vsel %vm3744_vm8, %v468_v43, %v469_v44  ;;  %v480_v21 = vsel %vm3744_vm8, %v478_v12, %v479_v11  ;;  %v864_v31 = vrot.slane %v3584_v27, 6  ;;  %v3244_v5 = vld [vmem:[#allocation2 + $0xc4] ss:$8 sps:$4 sm:$0xff]   ;;  %v3251_v12 = vld [vmem:[#allocation2] ss:$8 sps:$4 sm:$0xff]  }
  0x45   :  { %583 = vmatpush1.bf16.msra.mxu0 %v3179_v34  ;;  %v3202_v34 = vld [vmem:[%s4235_s1 + $0x1a4] ss:$8 sps:$4 sm:$0xff]   ;;  %v669_v62 = vsel %vm3782_vm10, %v663_v47, %v668_v7  ;;  %v877_v43 = vrot.slane %v3698_v23, 6  ;;  %v876_v44 = vrot.slane %v874_v38, 4  ;;  %v3217_v47 = vld [vmem:[#allocation2 + $0x74] ss:$8 sps:$4 sm:$0xff]  }
  0x46   :  { %792 = vmatpush1.bf16.msra.mxu1 %v3182_v56  ;;  %584 = vmatprep.subr.bf16.mxu0 %v3188_v1  ;;  %v474_v56 = vsel %vm3744_vm8, %v2731_v45, %v473_v46  ;;  %v677_v1 = vsel %vm3782_vm10, %v673_v50, %v676_v51  ;;  %v866_v42 = vrot.slane %v864_v31, 4  ;;  %v3215_v7 = vld [vmem:[#allocation2 + $0x70] ss:$8 sps:$4 sm:$0xff]   ;;  %v3218_v50 = vld [vmem:[#allocation2 + $0x60] ss:$8 sps:$4 sm:$0xff]   ;;  %vm1108_vm13 = vcmask 1040384  }
  0x47   :  { %793 = vmatprep.subr.bf16.mxu1 %v3191_v2  ;;  %v681_v2 = vor.u32 %v680_v52, %v679_v48  ;;  %v878_v23 = vsel %vm3869_vm12, %v876_v44, %v877_v43  ;;  %v3220_v48 = vld [vmem:[#allocation2 + $0x64] ss:$8 sps:$4 sm:$0xff]   ;;  %v3223_v51 = vld [vmem:[#allocation2 + $0x54] ss:$8 sps:$4 sm:$0xff]   ;;  %v3221_v52 = vld [vmem:[#allocation2 + $0x50] ss:$8 sps:$4 sm:$0xff]  }
  0x48   :  { %2710 = vmatmul.mubr.msk.bf16.gmra.mxu0 %vm228_vm4, %v2694_v9  ;;  %v3208_v9 = vld [vmem:[%s4235_s1 + $0x184] ss:$8 sps:$4 sm:$0xff]   ;;  %v868_v49 = vsel %vm3869_vm12, %v866_v42, %v867_v39  ;;  %vm1089_vm14 = vcmask 1046528   ;;  %vm1669_vm6 = vcmask 1044484   ;;  %v3331_v16 = vld [vmem:[#allocation2 + $0x214] ss:$8 sps:$4 sm:$0xff]  }
  0x49   :  { %2729 = vmatmul.mubr.msk.bf16.gmra.mxu1 %vm228_vm4, %v2713_v40  ;;  %585 = vmatpush1.bf16.msra.mxu0 %v3186_v8  ;;  %v2744_v40 = vcombine.low %v470_v28, %v474_v56  ;;  %v2774_v8 = vcombine.low %v669_v62, %v677_v1  ;;  %v683_v14 = vrot.slane %v681_v2, 4  ;;  %v682_v61 = vsel %vm3782_vm10, %v678_v36, %v681_v2  ;;  %v3232_v28 = vld [vmem:[#allocation2 + $0xe4] ss:$8 sps:$4 sm:$0xff]   ;;  %v3230_v56 = vld [vmem:[#allocation2 + $0xe0] ss:$8 sps:$4 sm:$0xff]   ;;  %vm4082_vm7 = vmor %vm1108_vm13, %vm1669_vm6 }
  0x4a   :  { %794 = vmatpush1.bf16.msra.mxu1 %v3189_v10  ;;  %586 = vmatprep.subr.bf16.mxu0 %v3194_v19  ;;  %v475_v10 = vrot.slane %v473_v46, 4  ;;  %v3233_v62 = vld [vmem:[#allocation2 + $0x30] ss:$8 sps:$4 sm:$0xff]   ;;  %v3241_v2 = vld [vmem:[#allocation2 + $0x24] ss:$8 sps:$4 sm:$0xff]  }
  0x4b   :  { %795 = vmatprep.subr.bf16.mxu1 %v3197_v20  ;;  %604 = vmatprep.mubr.bf16.mxu0 %v3451_v0  ;;  %v3211_v20 = vld [vmem:[%s4235_s1 + $0x174] ss:$8 sps:$4 sm:$0xff]   ;;  %v3236_v1 = vld [vmem:[#allocation2 + $0xd0] ss:$8 sps:$4 sm:$0xff]   ;;  %v3253_v11 = vld [vmem:[#allocation2 + $0x4] ss:$8 sps:$4 sm:$0xff]  }
  0x4c   :  { %813 = vmatprep.mubr.bf16.mxu1 %v3451_v0  ;;  %v477_v19 = vsel %vm3744_vm8, %v475_v10, %v476_v63  ;;  %v3238_v63 = vld [vmem:[#allocation2 + $0xd4] ss:$8 sps:$4 sm:$0xff]   ;;  %v3248_v10 = vld [vmem:[#allocation2 + $0xb0] ss:$8 sps:$4 sm:$0xff]   ;;  %v3256_v36 = vld [vmem:[#allocation2 + $0xa4] ss:$8 sps:$4 sm:$0xff]  }
  0x4d   :  { %587 = vmatpush1.bf16.msra.mxu0 %v3192_v3  ;;  %v689_v3 = vsel %vm3782_vm10, %v683_v14, %v688_v15  ;;  %v2745_v32 = vcombine.low %v477_v19, %v480_v21  ;;  %v3254_v14 = vld [vmem:[#allocation2 + $0xa0] ss:$8 sps:$4 sm:$0xff]   ;;  %v3259_v15 = vld [vmem:[#allocation2 + $0x1f4] ss:$8 sps:$4 sm:$0xff]   ;;  %v3260_v19 = vld [vmem:[#allocation2 + $0x90] ss:$8 sps:$4 sm:$0xff]  }
  0x4e   :  { %796 = vmatpush1.bf16.msra.mxu1 %v3195_v24  ;;  %2820 = vmatprep.subr.msk.bf16.mxu0 %vm238_vm0, %v2819_v41  ;;  %v861_v24 = vrot.slane %v3579_v26, 6  ;;  %v2775_v33 = vcombine.low %v682_v61, %v689_v3  ;;  %v3212_v26 = vld [vmem:[%s4235_s1 + $0x160] ss:$8 sps:$4 sm:$0xff]   ;;  %v871_v41 = vrot.slane %v3636_v55, 6  ;;  %v3268_v21 = vld [vmem:[#allocation2 + $0x84] ss:$8 sps:$4 sm:$0xff]  }
  0x4f   :  { %1298 = vmatprep.subr.bf16.mxu1 %v3226_v53  ;;  %v3274_v61 = vld [vmem:[#allocation2 + $0x174] ss:$8 sps:$4 sm:$0xff]   ;;  %vm2040_vm10 = vcmask 1045504  }
  0x50   :  { %2759 = vmatmul.mubr.msk.bf16.vlgmr.msra.gmra.mxu0 %vm228_vm4, %v2743_v17  ;;  %v863_v13 = vrot.slane %v861_v24, 4  ;;  %v862_v25 = vsel %vm3869_vm12, %v2792_v37, %v861_v24  ;;  %v872_v55 = vsel %vm3869_vm12, %v2793_v22, %v871_v41 }
  0x51   :  { %2789 = vmatmul.mubr.msk.bf16.vlgmr.msra.gmra.mxu1 %vm228_vm4, %v2773_v57  ;;  %975 = vmatpush1.bf16.msra.mxu0 %v965_v58  ;;  %v873_v57 = vrot.slane %v871_v41, 4  ;;  %v2806_v46 = vcombine.low %v868_v49, %v872_v55  ;;  %v3224_v58 = vld [vmem:[#allocation2 + $0xf0] ss:$8 sps:$4 sm:$0xff]  }
  0x52   :  { %614 = vmatprep.mubr.bf16.mxu0 %v3451_v0  ;;  %976 = vmatprep.subr.bf16.mxu0 %v3202_v34  ;;  %v865_v27 = vsel %vm3869_vm12, %v863_v13, %v864_v31  ;;  %v3229_v34 = vld [vmem:[#allocation2 + $0x44] ss:$8 sps:$4 sm:$0xff]  }
  0x53   :  { %823 = vmatprep.mubr.bf16.mxu1 %v3451_v0  ;;  %v2805_v45 = vcombine.low %v862_v25, %v865_v27  ;;  %v875_v54 = vsel %vm3869_vm12, %v873_v57, %v874_v38  ;;  %1299 = vmatpush1.bf16.msra.mxu1 %v3224_v58 }
  0x54   :  { %v2807_v17 = vcombine.low %v875_v54, %v878_v23  ;;  %1300 = vmatprep.subr.bf16.mxu1 %v3232_v28 }
  0x55   :  { %977 = vmatpush1.bf16.msra.mxu0 %v3200_v29  ;;  %v3227_v29 = vld [vmem:[#allocation2 + $0x40] ss:$8 sps:$4 sm:$0xff]  }
  0x56   :  { %978 = vmatprep.subr.bf16.mxu0 %v3205_v60  ;;  %v3235_v60 = vld [vmem:[#allocation2 + $0x34] ss:$8 sps:$4 sm:$0xff]  }
  0x57   :  { %1301 = vmatpush1.bf16.msra.mxu1 %v3230_v56 }
  0x58   :  { %2760 = vmatmul.mubr.msk.bf16.gmra.mxu0 %vm228_vm4, %v2744_v40  ;;  %1302 = vmatprep.subr.bf16.mxu1 %v3238_v63  ;;  %v3247_v40 = vld [vmem:[#allocation2 + $0x14] ss:$8 sps:$4 sm:$0xff]  }
  0x59   :  { %2790 = vmatmul.mubr.msk.bf16.gmra.mxu1 %vm228_vm4, %v2774_v8  ;;  %979 = vmatpush1.bf16.msra.mxu0 %v3203_v6  ;;  %v3242_v6 = vld [vmem:[#allocation2 + $0xc0] ss:$8 sps:$4 sm:$0xff]   ;;  %v3245_v8 = vld [vmem:[#allocation2 + $0x10] ss:$8 sps:$4 sm:$0xff]  }
  0x5a   :  { %624 = vmatprep.mubr.bf16.mxu0 %v3451_v0  ;;  %980 = vmatprep.subr.bf16.mxu0 %v3208_v9  ;;  %v3250_v9 = vld [vmem:[#allocation2 + $0xb4] ss:$8 sps:$4 sm:$0xff]  }
  0x5b   :  { %833 = vmatprep.mubr.bf16.mxu1 %v3451_v0  ;;  %1303 = vmatpush1.bf16.msra.mxu1 %v3236_v1 }
  0x5c   :  { %1304 = vmatprep.subr.bf16.mxu1 %v3244_v5 }
  0x5d   :  { %981 = vmatpush1.bf16.msra.mxu0 %v3206_v18  ;;  %v3262_v18 = vld [vmem:[#allocation2 + $0x94] ss:$8 sps:$4 sm:$0xff]  }
  0x5e   :  { %982 = vmatprep.subr.bf16.mxu0 %v3211_v20  ;;  %v3266_v20 = vld [vmem:[#allocation2 + $0x80] ss:$8 sps:$4 sm:$0xff]  }
  0x5f   :  { %1305 = vmatpush1.bf16.msra.mxu1 %v3242_v6 }
  0x60   :  { %2761 = vmatmul.mubr.msk.bf16.gmra.mxu0 %vm228_vm4, %v2745_v32  ;;  %1306 = vmatprep.subr.bf16.mxu1 %v3250_v9 }
  0x61   :  { %2791 = vmatmul.mubr.msk.bf16.gmra.mxu1 %vm228_vm4, %v2775_v33  ;;  %983 = vmatpush1.bf16.msra.mxu0 %v3209_v30 }
  0x62   :  { %1002 = vmatprep.mubr.bf16.mxu0 %v3451_v0  ;;  %984 = vmatprep.subr.bf16.mxu0 %v3214_v35 }
  0x63   :  { %1330 = vmatprep.mubr.bf16.mxu1 %v3451_v0  ;;  %1307 = vmatpush1.bf16.msra.mxu1 %v3248_v10 }
  0x64   :  { %1308 = vmatprep.subr.bf16.mxu1 %v3256_v36 }
  0x65   :  { %985 = vmatpush1.bf16.msra.mxu0 %v3212_v26 }
  0x66   :  { %1435 = vmatprep.subr.bf16.mxu0 %v3217_v47 }
  0x67   :  { %1309 = vmatpush1.bf16.msra.mxu1 %v3254_v14 }
  0x68   :  { %2821 = vmatmul.mubr.msk.bf16.vlgmr.msra.gmra.mxu0 %vm228_vm4, %v2805_v45  ;;  %1310 = vmatprep.subr.bf16.mxu1 %v3262_v18 }
  0x69   :  { %1012 = vmatprep.mubr.bf16.mxu0 %v3451_v0  ;;  %1436 = vmatpush1.bf16.msra.mxu0 %v3215_v7 }
  0x6a   :  { %1437 = vmatprep.subr.bf16.mxu0 %v3220_v48 }
  0x6b   :  { %1311 = vmatpush1.bf16.msra.mxu1 %v3260_v19 }
  0x6c   :  { %1312 = vmatprep.subr.bf16.mxu1 %v3268_v21 }
  0x6d   :  { %1438 = vmatpush1.bf16.msra.mxu0 %v3218_v50 }
  0x6e   :  { %1439 = vmatprep.subr.bf16.mxu0 %v3223_v51 }
  0x6f   :  { %1313 = vmatpush1.bf16.msra.mxu1 %v3266_v20 }
  0x70   :  { %2822 = vmatmul.mubr.msk.bf16.gmra.mxu0 %vm228_vm4, %v2806_v46  ;;  %1607 = vmatprep.subr.bf16.mxu1 %v3274_v61 }
  0x71   :  { %1022 = vmatprep.mubr.bf16.mxu0 %v3451_v0  ;;  %1440 = vmatpush1.bf16.msra.mxu0 %v3221_v52 }
  0x72   :  { %1441 = vmatprep.subr.bf16.mxu0 %v3229_v34 }
  0x75   :  { %1442 = vmatpush1.bf16.msra.mxu0 %v3227_v29 }
  0x76   :  { %1443 = vmatprep.subr.bf16.mxu0 %v3235_v60 }
  0x78   :  { %2823 = vmatmul.mubr.msk.bf16.gmra.mxu0 %vm228_vm4, %v2807_v17 }
  0x79   :  { %1467 = vmatprep.mubr.bf16.mxu0 %v3451_v0  ;;  %1444 = vmatpush1.bf16.msra.mxu0 %v3233_v62 }
  0x7a   :  { %1445 = vmatprep.subr.bf16.mxu0 %v3241_v2  ;;  %v1064_v2 = vlaneseq }
  0x7d   :  { %1446 = vmatpush1.bf16.msra.mxu0 %v3239_v4 }
  0x7e   :  { %1447 = vmatprep.subr.bf16.mxu0 %v3247_v40 }
  0x81   :  { %1448 = vmatpush1.bf16.msra.mxu0 %v3245_v8 }
  0x82   :  { %1449 = vmatprep.subr.bf16.mxu0 %v3253_v11 }
  0x85   :  { %1450 = vmatpush1.bf16.msra.mxu0 %v3251_v12  ;;  %v3953_v12 = vshrl.u32 %v1064_v2, 7 }
  0x86   :  { %1790 = vmatprep.subr.bf16.mxu0 %v3259_v15 }
  0x87   :  { %v3956_v20 = vadd.s32 8, %v3953_v12 }
  0xf8   :  { %v279_v3 = vpop.f32.mrf.mxu0 }
  0xf9   :  { %v427_v24 = vpop.f32.mrf.mxu1 }
  0xfa   :  { %v281_v30 = vpop.f32.mrf.mxu0  ;;  %v428_v62 = vadd.f32 %v427_v24, %v279_v3 }
  0xfb   :  { %v429_v32 = vpop.f32.mrf.mxu1 }
  0xfc   :  { %v283_v33 = vpop.f32.mrf.mxu0  ;;  %v430_v63 = vadd.f32 %v429_v32, %v281_v30  ;;  %v3961_v32 = vld [vmem:[%s4236_s2] ss:$0 sm:$0xff] }
  0xfd   :  { %v431_v35 = vpop.f32.mrf.mxu1 }
  0xfe   :  { %v285_v37 = vpop.f32.mrf.mxu0  ;;  %v432_v6 = vadd.f32 %v431_v35, %v283_v33 }
  0xff   :  { %v433_v13 = vpop.f32.mrf.mxu1 }
 0x100   :  { %v289_v31 = vpop.f32.mrf.mxu0  ;;  %v434_v9 = vadd.f32 %v433_v13, %v285_v37 }
 0x101   :  { %v437_v26 = vpop.f32.mrf.mxu1 }
 0x102   :  { %v291_v38 = vpop.f32.mrf.mxu0  ;;  %v438_v21 = vadd.f32 %v437_v26, %v289_v31  ;;  %v1071_v31 = vand.u32 1, %v3953_v12  ;;  %v1072_v26 = vand.u32 1, %v3956_v20 }
 0x103   :  { %v439_v25 = vpop.f32.mrf.mxu1 }
 0x104   :  { %v293_v27 = vpop.f32.mrf.mxu0  ;;  %v440_v61 = vadd.f32 %v439_v25, %v291_v38  ;;  %vm3971_vm15 = vcmp.eq.s32.totalorder %v1071_v31, 0  ;;  %vm3975_vm1 = vcmp.eq.s32.totalorder %v1072_v26, 0 }
 0x105   :  { %v441_v39 = vpop.f32.mrf.mxu1 }
 0x106   :  { %v295_v41 = vpop.f32.mrf.mxu0 }
 0x107   :  { %v443_v42 = vpop.f32.mrf.mxu1 }
 0x108   :  { %v3930_v22 = vpop.f32.mrf.mxu0 }
 0x109   :  { %v3932_v43 = vpop.f32.mrf.mxu1 }
 0x10a   :  { %v3934_v57 = vpop.f32.mrf.mxu0 }
 0x10b   :  { %v3936_v44 = vpop.f32.mrf.mxu1 }
 0x10c   :  { %v3938_v45 = vpop.f32.mrf.mxu0 }
 0x10d   :  { %v3940_v49 = vpop.f32.mrf.mxu1 }
 0x10e   :  { %v3942_v55 = vpop.f32.mrf.mxu0 }
 0x10f   :  { %v3944_v46 = vpop.f32.mrf.mxu1 }
 0x110   :  { %v606_v54 = vpop.f32.mrf.mxu0 }
 0x111   :  { %v815_v23 = vpop.f32.mrf.mxu1  ;;  %v635_v4 = vadd.f32 %v606_v54, %v428_v62 }
 0x112   :  { %v608_v17 = vpop.f32.mrf.mxu0 }
 0x113   :  { %v817_v47 = vpop.f32.mrf.mxu1  ;;  %v636_v5 = vadd.f32 %v608_v17, %v430_v63  ;;  %v844_v36 = vadd.f32 %v815_v23, %v635_v4  ;;  %v442_v23 = vadd.f32 %v441_v39, %v293_v27  ;;  %v444_v17 = vadd.f32 %v443_v42, %v295_v41 }
 0x114   :  { %v610_v7 = vpop.f32.mrf.mxu0  ;;  %v448_v41 = vadd.f32 %v3932_v43, %v3930_v22 }
 0x115   :  { %v819_v50 = vpop.f32.mrf.mxu1  ;;  %v637_v10 = vadd.f32 %v610_v7, %v432_v6  ;;  %v845_v14 = vadd.f32 %v817_v47, %v636_v5 }
 0x116   :  { %v612_v48 = vpop.f32.mrf.mxu0 }
 0x117   :  { %v821_v52 = vpop.f32.mrf.mxu1  ;;  %v638_v15 = vadd.f32 %v612_v48, %v434_v9  ;;  %v846_v30 = vadd.f32 %v819_v50, %v637_v10 }
 0x118   :  { %v616_v51 = vpop.f32.mrf.mxu0 }
 0x119   :  { %v825_v34 = vpop.f32.mrf.mxu1  ;;  %v639_v35 = vadd.f32 %v616_v51, %v438_v21  ;;  %v847_v37 = vadd.f32 %v821_v52, %v638_v15  ;;  %v3967_v51 = vadd.s32 16, %v3953_v12  ;;  %v452_v21 = vadd.f32 %v3940_v49, %v3938_v45 }
 0x11a   :  { %v618_v53 = vpop.f32.mrf.mxu0  ;;  %v3995_v49 = vadd.s32 24, %v3953_v12 }
 0x11b   :  { %v827_v56 = vpop.f32.mrf.mxu1  ;;  %v640_v13 = vadd.f32 %v618_v53, %v440_v61  ;;  %v848_v52 = vadd.f32 %v825_v34, %v639_v35  ;;  %v450_v34 = vadd.f32 %v3936_v44, %v3934_v57  ;;  %v454_v57 = vadd.f32 %v3944_v46, %v3942_v55 }
 0x11c   :  { %v620_v58 = vpop.f32.mrf.mxu0 }
 0x11d   :  { %v829_v40 = vpop.f32.mrf.mxu1  ;;  %v641_v50 = vadd.f32 %v620_v58, %v442_v23  ;;  %v849_v27 = vadd.f32 %v827_v56, %v640_v13 }
 0x11e   :  { %v622_v29 = vpop.f32.mrf.mxu0 }
 0x11f   :  { %v831_v18 = vpop.f32.mrf.mxu1  ;;  %v642_v62 = vadd.f32 %v622_v29, %v444_v17  ;;  %v850_v9 = vadd.f32 %v829_v40, %v641_v50 }
 0x120   :  { %v626_v28 = vpop.f32.mrf.mxu0 }
 0x121   :  { %v835_v47 = vpop.f32.mrf.mxu1  ;;  %v643_v22 = vadd.f32 %v626_v28, %v448_v41  ;;  %v851_v43 = vadd.f32 %v831_v18, %v642_v62  ;;  %v1069_v62 = vadd.s32 32, %v3953_v12 }
 0x122   :  { %v3946_v60 = vpop.f32.mrf.mxu0 }
 0x123   :  { %v837_v42 = vpop.f32.mrf.mxu1 }
 0x124   :  { %v3948_v1 = vpop.f32.mrf.mxu0 }
 0x125   :  { %v839_v44 = vpop.f32.mrf.mxu1 }
 0x126   :  { %v3950_v8 = vpop.f32.mrf.mxu0 }
 0x127   :  { %v646_v46 = vadd.f32 %v3950_v8, %v454_v57 }
 0x128   :  { %v1004_v11 = vpop.f32.mrf.mxu0 }
 0x129   :  { %v1033_v3 = vadd.f32 %v1004_v11, %v844_v36  ;;  %v1073_v11 = vand.u32 1, %v3967_v51  ;;  %v644_v36 = vadd.f32 %v3946_v60, %v450_v34 }
 0x12a   :  { %v1006_v19 = vpop.f32.mrf.mxu0 }
 0x12b   :  { %v1034_v24 = vadd.f32 %v1006_v19, %v845_v14  ;;  %v853_v55 = vadd.f32 %v837_v42, %v644_v36  ;;  %vm3999_vm2 = vcmp.eq.s32.totalorder %v1073_v11, 0 }
 0x12c   :  { %v1008_v33 = vpop.f32.mrf.mxu0 }
 0x12d   :  { %v1045_v54 = vmax.f32 %v1033_v3, %v1034_v24  ;;  %v1035_v25 = vadd.f32 %v1008_v33, %v846_v30  ;;  %v852_v30 = vadd.f32 %v835_v47, %v643_v22  ;;  %v645_v33 = vadd.f32 %v3948_v1, %v452_v21 }
 0x12e   :  { %v1010_v7 = vpop.f32.mrf.mxu0 }
 0x12f   :  { %v1058_v38 = vadd.f32 %v3961_v32, %v1045_v54  ;;  %v1036_v48 = vadd.f32 %v1010_v7, %v847_v37  ;;  %v841_v54 = vpop.f32.mrf.mxu1 }
 0x130   :  { %v1014_v63 = vpop.f32.mrf.mxu0 }
 0x131   :  { %v1046_v39 = vmax.f32 %v1035_v25, %v1036_v48  ;;  %v1109_v53 = vrot.slane %v1058_v38, 7  ;;  %v1037_v56 = vadd.f32 %v1014_v63, %v848_v52  ;;  %v1090_v14 = vrot.slane %v1058_v38, 1 }
 0x132   :  { %v1016_v4 = vpop.f32.mrf.mxu0  ;;  %v1070_v63 = vadd.s32 40, %v3953_v12  ;;  %v1074_v52 = vand.u32 1, %v3995_v49 }
 0x133   :  { %v1059_v29 = vadd.f32 %v3961_v32, %v1046_v39  ;;  %v1038_v6 = vadd.f32 %v1016_v4, %v849_v27  ;;  %v1126_v61 = vsel %vm1108_vm13, %v1058_v38, %v1109_v53  ;;  %v854_v27 = vadd.f32 %v839_v44, %v645_v33  ;;  %v3290_v33 = vld [vmem:[#allocation2 + $0x140] ss:$8 sps:$4 sm:$0xff]  }
 0x134   :  { %v1018_v10 = vpop.f32.mrf.mxu0  ;;  %v855_v39 = vadd.f32 %v841_v54, %v646_v46  ;;  %v1076_v11 = vand.u32 1, %v1070_v63  ;;  %vm4015_vm3 = vcmp.eq.s32.totalorder %v1074_v52, 0  ;;  %v3271_v54 = vld [vmem:[#allocation2 + $0x1d4] ss:$8 sps:$4 sm:$0xff]  }
 0x135   :  { %v1091_v15 = vrot.slane %v1059_v29, 1  ;;  %v1047_v19 = vmax.f32 %v1037_v56, %v1038_v6  ;;  %v1110_v40 = vrot.slane %v1059_v29, 7  ;;  %v1039_v24 = vadd.f32 %v1018_v10, %v850_v9 }
 0x136   :  { %v1020_v28 = vpop.f32.mrf.mxu0  ;;  %v1075_v10 = vand.u32 1, %v1069_v62  ;;  %vm4034_vm5 = vcmp.eq.s32.totalorder %v1076_v11, 0 }
 0x137   :  { %v1092_v18 = vsel %vm1089_vm14, %v1090_v14, %v1091_v15  ;;  %v1060_v3 = vadd.f32 %v3961_v32, %v1047_v19  ;;  %v1040_v60 = vadd.f32 %v1020_v28, %v851_v43  ;;  %v1111_v23 = vsel %vm1108_vm13, %v1109_v53, %v1110_v40  ;;  %v3257_v19 = vld [vmem:[#allocation2 + $0x1f0] ss:$8 sps:$4 sm:$0xff]  }
 0x138   :  { %v1024_v35 = vpop.f32.mrf.mxu0  ;;  %v1127_v45 = vsel %vm3971_vm15, %v1092_v18, %v1126_v61  ;;  %vm4030_vm4 = vcmp.eq.s32.totalorder %v1075_v10, 0 }
 0x139   :  { %v1093_v37 = vrot.slane %v1060_v3, 1  ;;  %v1048_v13 = vmax.f32 %v1039_v24, %v1040_v60  ;;  %v1112_v17 = vrot.slane %v1060_v3, 7  ;;  %v1133_v7 = vmax.f32 %v1058_v38, %v1127_v45 }
 0x13a   :  { %v1026_v1 = vpop.f32.mrf.mxu0  ;;  %v1041_v25 = vadd.f32 %v1024_v35, %v852_v30  ;;  %v3287_v30 = vld [vmem:[#allocation2 + $0x1a0] ss:$8 sps:$4 sm:$0xff]  }
 0x13b   :  { %v1094_v31 = vsel %vm1089_vm14, %v1091_v15, %v1093_v37  ;;  %v1061_v26 = vadd.f32 %v3961_v32, %v1048_v13  ;;  %v1042_v48 = vadd.f32 %v1026_v1, %v853_v55  ;;  %v1113_v42 = vsel %vm1108_vm13, %v1110_v40, %v1112_v17  ;;  %v3265_v40 = vld [vmem:[#allocation2 + $0x1e4] ss:$8 sps:$4 sm:$0xff]  }
 0x13c   :  { %v1028_v50 = vpop.f32.mrf.mxu0  ;;  %v1128_v8 = vsel %vm3975_vm1, %v1094_v31, %v1111_v23  ;;  %v1139_v34 = vmax.f32 %v1133_v7, 0.0 }
 0x13d   :  { %v1095_v41 = vrot.slane %v1061_v26, 1  ;;  %v1049_v38 = vmax.f32 %v1041_v25, %v1042_v48  ;;  %v1114_v53 = vrot.slane %v1061_v26, 7  ;;  %v1134_v5 = vmax.f32 %v1059_v29, %v1128_v8  ;;  %v3272_v8 = vld [vmem:[#allocation2 + $0x170] ss:$8 sps:$4 sm:$0xff]  }
 0x13e   :  { %v1030_v4 = vpop.f32.mrf.mxu0  ;;  %v1043_v6 = vadd.f32 %v1028_v50, %v854_v27  ;;  %v4021_v44 = vpack.c.bf16 %v1139_v34, %v1139_v34  ;;  %v3269_v50 = vld [vmem:[#allocation2 + $0x1d0] ss:$8 sps:$4 sm:$0xff]  }
 0x13f   :  { %v1096_v56 = vsel %vm1089_vm14, %v1093_v37, %v1095_v41  ;;  %v1062_v58 = vadd.f32 %v3961_v32, %v1049_v38  ;;  %v1044_v9 = vadd.f32 %v1030_v4, %v855_v39  ;;  %v1140_v43 = vmax.f32 %v1134_v5, 0.0  ;;  %v3280_v38 = vld [vmem:[#allocation2 + $0x164] ss:$8 sps:$4 sm:$0xff]  }
 0x140   :  { %v1129_v22 = vsel %vm3999_vm2, %v1096_v56, %v1113_v42  ;;  %v1115_v28 = vsel %vm1108_vm13, %v1112_v17, %v1114_v53  ;;  %v2831_v23 = vrot.slane %v4021_v44, 9  ;;  %v3278_v56 = vld [vmem:[#allocation2 + $0x160] ss:$8 sps:$4 sm:$0xff]  }
 0x141   :  { %v1135_v36 = vmax.f32 %v1060_v3, %v1129_v22  ;;  %v1097_v14 = vrot.slane %v1062_v58, 1  ;;  %v1050_v15 = vmax.f32 %v1043_v6, %v1044_v9  ;;  %v1116_v29 = vrot.slane %v1062_v58, 7  ;;  %v3283_v22 = vld [vmem:[#allocation2 + $0x1b4] ss:$8 sps:$4 sm:$0xff]  }
 0x142   :  { %v4019_v57 = vpack.c.bf16 %v1140_v43, %v1139_v34  ;;  %v4023_v61 = vpack.c.bf16 %v1140_v43, %v1140_v43  ;;  %v3275_v34 = vld [vmem:[#allocation2 + $0x1c0] ss:$8 sps:$4 sm:$0xff]   ;;  %v3286_v43 = vld [vmem:[#allocation2 + $0x154] ss:$8 sps:$4 sm:$0xff]  }
 0x143   :  { %v1141_v18 = vmax.f32 %v1135_v36, 0.0  ;;  %v1098_v3 = vsel %vm1089_vm14, %v1095_v41, %v1097_v14  ;;  %v1063_v24 = vadd.f32 %v3961_v32, %v1050_v15  ;;  %v3263_v32 = vld [vmem:[#allocation2 + $0x1e0] ss:$8 sps:$4 sm:$0xff]   ;;  %v1117_v13 = vsel %vm1108_vm13, %v1114_v53, %v1116_v29  ;;  %v3277_v41 = vld [vmem:[#allocation2 + $0x1c4] ss:$8 sps:$4 sm:$0xff]  }
 0x144   :  { %1468 = vmatmul.mubr.bf16.vlgmr.msra.gmra.mxu0 %v4019_v57  ;;  %v1181_v60 = vrot.slane %v4023_v61, 5  ;;  %v1130_v35 = vsel %vm4015_vm3, %v1098_v3, %v1115_v28  ;;  %v3289_v28 = vld [vmem:[#allocation2 + $0x1a4] ss:$8 sps:$4 sm:$0xff]  }
 0x145   :  { %v4040_v45 = vpack.c.bf16 %v1141_v18, %v1141_v18  ;;  %v1099_v55 = vrot.slane %v1063_v24, 1  ;;  %v1118_v46 = vrot.slane %v1063_v24, 7  ;;  %1791 = vmatpush1.bf16.msra.mxu0 %v3257_v19  ;;  %1477 = vmatprep.mubr.bf16.mxu0 %v3451_v0  ;;  %v1136_v37 = vmax.f32 %v1061_v26, %v1130_v35  ;;  %v3284_v19 = vld [vmem:[#allocation2 + $0x150] ss:$8 sps:$4 sm:$0xff]   ;;  %v3295_v35 = vld [vmem:[#allocation2 + $0x194] ss:$8 sps:$4 sm:$0xff]  }
 0x146   :  { %1792 = vmatprep.subr.bf16.mxu0 %v3265_v40  ;;  %v1183_v17 = vrot.slane %v1181_v60, 4  ;;  %v1182_v62 = vsel %vm3744_vm8, %v2831_v23, %v1181_v60  ;;  %v3299_v23 = vld [vmem:[#allocation2 + $0x180] ss:$8 sps:$4 sm:$0xff]  }
 0x147   :  { %v1107_v47 = vsel %vm1089_vm14, %v1099_v55, %v1063_v24  ;;  %v1184_v1 = vrot.slane %v4040_v45, 5  ;;  %v1100_v7 = vsel %vm1089_vm14, %v1097_v14, %v1099_v55  ;;  %v1119_v31 = vsel %vm1108_vm13, %v1116_v29, %v1118_v46  ;;  %v3281_v14 = vld [vmem:[#allocation2 + $0x1b0] ss:$8 sps:$4 sm:$0xff]   ;;  %v3298_v55 = vld [vmem:[#allocation2 + $0x134] ss:$8 sps:$4 sm:$0xff]  }
 0x148   :  { %v1131_v25 = vsel %vm4030_vm4, %v1100_v7, %v1117_v13  ;;  %v1132_v26 = vsel %vm4034_vm5, %v1107_v47, %v1119_v31  ;;  %v1142_v48 = vmax.f32 %v1136_v37, 0.0  ;;  %v3293_v46 = vld [vmem:[#allocation2 + $0x190] ss:$8 sps:$4 sm:$0xff]   ;;  %v3301_v37 = vld [vmem:[#allocation2 + $0x184] ss:$8 sps:$4 sm:$0xff]   ;;  %v2887_v31 = vrot.slane %v4021_v44, 11 }
 0x149   :  { %1793 = vmatpush1.bf16.msra.mxu0 %v3263_v32  ;;  %v1185_v63 = vsel %vm3744_vm8, %v1183_v17, %v1184_v1  ;;  %v1137_v52 = vmax.f32 %v1062_v58, %v1131_v25  ;;  %v1138_v27 = vmax.f32 %v1063_v24, %v1132_v26  ;;  %v3292_v24 = vld [vmem:[#allocation2 + $0x144] ss:$8 sps:$4 sm:$0xff]   ;;  %v1673_v32 = vrot.slane %v4023_v61, 7  ;;  %v3302_v17 = vld [vmem:[#allocation2 + $0x120] ss:$8 sps:$4 sm:$0xff]   ;;  %v3344_v1 = vld [vmem:[#allocation5 + $0x58] sm:$0xff]  }
 0x14a   :  { %1794 = vmatprep.subr.bf16.mxu0 %v3271_v54  ;;  %v2833_v39 = vcombine.low %v1182_v62, %v1185_v63  ;;  %v4057_v4 = vpack.c.bf16 %v1142_v48, %v1141_v18  ;;  %v4059_v5 = vpack.c.bf16 %v1142_v48, %v1142_v48  ;;  %v3304_v13 = vld [vmem:[#allocation2 + $0x124] ss:$8 sps:$4 sm:$0xff]   ;;  %v1676_v54 = vrot.slane %v4040_v45, 7  ;;  %v3307_v7 = vld [vmem:[#allocation2 + $0x114] ss:$8 sps:$4 sm:$0xff]  }
 0x14b   :  { %v1143_v42 = vmax.f32 %v1137_v52, 0.0  ;;  %v1144_v53 = vmax.f32 %v1138_v27, 0.0  ;;  %v1675_v47 = vrot.slane %v1673_v32, 4  ;;  %v1674_v48 = vsel %vm4082_vm7, %v2887_v31, %v1673_v32  ;;  %v3310_v63 = vld [vmem:[#allocation2 + $0x104] ss:$8 sps:$4 sm:$0xff]   ;;  %v3346_v31 = vld [vmem:[#allocation5 + $0x50] sm:$0xff]  }
 0x14c   :  { %1331 = vmatmul.mubr.bf16.vlgmr.msra.gmra.mxu1 %v2833_v39  ;;  %v1154_v10 = vunpack.c.h.b16 %v4057_v4  ;;  %v2832_v21 = vrot.slane %v4059_v5, 9  ;;  %v1493_v27 = vrot.slane %v4040_v45, 6  ;;  %v3308_v39 = vld [vmem:[#allocation2 + $0x100] ss:$8 sps:$4 sm:$0xff]   ;;  %vm2101_vm14 = vcmask 1041409  }
 0x14d   :  { %1795 = vmatpush1.bf16.msra.mxu0 %v3269_v50  ;;  %1608 = vmatpush1.bf16.msra.mxu1 %v3272_v8  ;;  %v4061_v6 = vpack.c.bf16 %v1144_v53, %v1143_v42  ;;  %v4063_v9 = vpack.c.bf16 %v1143_v42, %v1143_v42  ;;  %v4065_v58 = vpack.c.bf16 %v1144_v53, %v1144_v53  ;;  %v3305_v50 = vld [vmem:[#allocation2 + $0x110] ss:$8 sps:$4 sm:$0xff]   ;;  %v1490_v8 = vrot.slane %v4023_v61, 6  ;;  %v3313_v53 = vld [vmem:[#allocation2 + $0x274] ss:$8 sps:$4 sm:$0xff]  }
 0x14e   :  { %1796 = vmatprep.subr.bf16.mxu0 %v3277_v41  ;;  %1609 = vmatprep.subr.bf16.mxu1 %v3280_v38  ;;  %v1677_v25 = vsel %vm4082_vm7, %v1675_v47, %v1676_v54  ;;  %v2867_v42 = vrot.slane %v4021_v44, 10  ;;  %v2888_v61 = vrot.slane %v4059_v5, 11  ;;  %v3336_v54 = vld [vmem:[#allocation5 + $0x78] sm:$0xff]  }
 0x14f   :  { %v1155_v11 = vunpack.c.l.b16 %v4061_v6  ;;  %1340 = vmatprep.mubr.bf16.mxu1 %v3451_v0  ;;  %v1188_v36 = vrot.slane %v4063_v9, 5  ;;  %v1191_v40 = vrot.slane %v4065_v58, 5  ;;  %v1680_v26 = vrot.slane %v4063_v9, 7  ;;  %v3343_v47 = vld [vmem:[#allocation5 + $0x18] sm:$0xff]  }
 0x150   :  { %v2889_v62 = vcombine.low %v1674_v48, %v1677_v25  ;;  %v1683_v41 = vrot.slane %v4065_v58, 7  ;;  %v1492_v38 = vrot.slane %v1490_v8, 4  ;;  %v3347_v25 = vld [vmem:[#allocation5 + $0x8] sm:$0xff]   ;;  %v3349_v48 = vld [vmem:[#allocation5] sm:$0xff]  }
 0x151   :  { %1797 = vmatpush1.bf16.msra.mxu0 %v3275_v34  ;;  %1610 = vmatpush1.bf16.msra.mxu1 %v3278_v56  ;;  %v1352_v15 = vpack.c.b16 %v1155_v11, %v1154_v10  ;;  %v1190_v29 = vrot.slane %v1188_v36, 4  ;;  %v1189_v18 = vsel %vm3744_vm8, %v2832_v21, %v1188_v36  ;;  %v1682_v52 = vrot.slane %v1680_v26, 4  ;;  %v3311_v10 = vld [vmem:[#allocation2 + $0x270] ss:$8 sps:$4 sm:$0xff]   ;;  %v3316_v36 = vld [vmem:[#allocation2 + $0x264] ss:$8 sps:$4 sm:$0xff]  }
 0x152   :  { %1798 = vmatprep.subr.bf16.mxu0 %v3283_v22  ;;  %1611 = vmatprep.subr.bf16.mxu1 %v3286_v43  ;;  %v1494_v45 = vsel %vm3869_vm12, %v1492_v38, %v1493_v27  ;;  %v1497_v56 = vrot.slane %v4063_v9, 6  ;;  %v1681_v22 = vsel %vm4082_vm7, %v2888_v61, %v1680_v26  ;;  %v1491_v43 = vsel %vm3869_vm12, %v2867_v42, %v1490_v8  ;;  %v3348_v26 = vld [vmem:[#allocation5 + $0x48] sm:$0xff]  }
 0x153   :  { %1478 = vmatmul.mubr.bf16.gmra.mxu0 %v1352_v15  ;;  %v1192_v3 = vsel %vm3744_vm8, %v1190_v29, %v1191_v40  ;;  %v1684_v34 = vsel %vm4082_vm7, %v1682_v52, %v1683_v41  ;;  %v2869_v11 = vcombine.low %v1491_v43, %v1494_v45  ;;  %v3314_v15 = vld [vmem:[#allocation2 + $0x260] ss:$8 sps:$4 sm:$0xff]   ;;  %v1500_v9 = vrot.slane %v4065_v58, 6  ;;  %v3325_v58 = vld [vmem:[#allocation2 + $0x234] ss:$8 sps:$4 sm:$0xff]  }
 0x154   :  { %v2834_v60 = vcombine.low %v1189_v18, %v1192_v3  ;;  %1822 = vmatprep.mubr.bf16.mxu0 %v3451_v0  ;;  %v2890_v44 = vcombine.low %v1681_v22, %v1684_v34  ;;  %v2868_v21 = vrot.slane %v4059_v5, 10  ;;  %v3322_v3 = vld [vmem:[#allocation2 + $0x244] ss:$8 sps:$4 sm:$0xff]   ;;  %v3323_v5 = vld [vmem:[#allocation2 + $0x230] ss:$8 sps:$4 sm:$0xff]   ;;  %vm3453_vm8 = vmmov 0  }
 0x155   :  { %1799 = vmatpush1.bf16.msra.mxu0 %v3281_v14  ;;  %1612 = vmatpush1.bf16.msra.mxu1 %v3284_v19  ;;  %v1499_v14 = vrot.slane %v1497_v56, 4  ;;  %v3319_v19 = vld [vmem:[#allocation2 + $0x254] ss:$8 sps:$4 sm:$0xff]  }
 0x156   :  { %1341 = vmatmul.mubr.bf16.gmra.mxu1 %v2834_v60  ;;  %1800 = vmatprep.subr.bf16.mxu0 %v3289_v28  ;;  %v1498_v40 = vsel %vm3869_vm12, %v2868_v21, %v1497_v56  ;;  %v3317_v28 = vld [vmem:[#allocation2 + $0x250] ss:$8 sps:$4 sm:$0xff]   ;;  %v3328_v60 = vld [vmem:[#allocation2 + $0x224] ss:$8 sps:$4 sm:$0xff]  }
 0x157   :  { %1613 = vmatprep.subr.bf16.mxu1 %v3292_v24  ;;  %1639 = vmatprep.mubr.bf16.mxu1 %v3451_v0  ;;  %v1501_v29 = vsel %vm3869_vm12, %v1499_v14, %v1500_v9  ;;  %v3320_v24 = vld [vmem:[#allocation2 + $0x240] ss:$8 sps:$4 sm:$0xff]  }
 0x158   :  { %v2870_v18 = vcombine.low %v1498_v40, %v1501_v29 }
 0x159   :  { %1801 = vmatpush1.bf16.msra.mxu0 %v3287_v30  ;;  %1614 = vmatpush1.bf16.msra.mxu1 %v3290_v33  ;;  %v3326_v30 = vld [vmem:[#allocation2 + $0x220] ss:$8 sps:$4 sm:$0xff]   ;;  %v3329_v33 = vld [vmem:[#allocation2 + $0x210] ss:$8 sps:$4 sm:$0xff]  }
 0x15a   :  { %1802 = vmatprep.subr.bf16.mxu0 %v3295_v35  ;;  %1615 = vmatprep.subr.bf16.mxu1 %v3298_v55  ;;  %v3334_v35 = vld [vmem:[#allocation2 + $0x204] ss:$8 sps:$4 sm:$0xff]   ;;  %v3332_v55 = vld [vmem:[#allocation2 + $0x200] ss:$8 sps:$4 sm:$0xff]  }
 0x15d   :  { %1803 = vmatpush1.bf16.msra.mxu0 %v3293_v46  ;;  %1616 = vmatpush1.bf16.msra.mxu1 %v3296_v59  ;;  %v1153_v46 = vunpack.c.l.b16 %v4057_v4  ;;  %v1152_v59 = vunpack.c.h.b16 %v4019_v57  ;;  %v3337_v57 = vld [vmem:[#allocation5 + $0x30] sm:$0xff]  }
 0x15e   :  { %1804 = vmatprep.subr.bf16.mxu0 %v3301_v37  ;;  %1617 = vmatprep.subr.bf16.mxu1 %v3304_v13  ;;  %v3452_v37 = vmov 0.0   ;;  %v3335_v13 = vld [vmem:[#allocation5 + $0x38] sm:$0xff]   ;;  %v3338_v4 = vld [vmem:[#allocation5 + $0x70] sm:$0xff]  }
 0x15f   :  { %v1868_v32 = vpack.c.b16 %v1153_v46, %v1152_v59 }
 0x161   :  { %1805 = vmatpush1.bf16.msra.mxu0 %v3299_v23  ;;  %1618 = vmatpush1.bf16.msra.mxu1 %v3302_v17  ;;  %v3341_v23 = vld [vmem:[#allocation5 + $0x20] sm:$0xff]  }
 0x162   :  { %1619 = vmatprep.subr.bf16.mxu1 %v3307_v7  ;;  %3017 = vmatprep.subr.bf16.mxu0 %v3452_v37  ;;  %v3342_v17 = vld [vmem:[#allocation5 + $0x60] sm:$0xff]   ;;  %v3345_v7 = vld [vmem:[#allocation5 + $0x10] sm:$0xff]  }
 0x164   :  { %1823 = vmatmul.mubr.bf16.vlgmr.msra.gmra.mxu0 %v2889_v62 }
 0x165   :  { %1620 = vmatpush1.bf16.msra.mxu1 %v3305_v50  ;;  %1832 = vmatprep.mubr.bf16.mxu0 %v3451_v0  ;;  %v3350_v50 = vld [vmem:[#allocation5 + $0x40] sm:$0xff]  }
 0x166   :  { %1621 = vmatprep.subr.bf16.mxu1 %v3310_v63  ;;  %3018 = vmatpush3.bf16.msra.mxu0 %v3335_v13 }
 0x167   :  { %3019 = vmatprep.subr.bf16.mxu0 %v3452_v37 }
 0x169   :  { %1622 = vmatpush1.bf16.msra.mxu1 %v3308_v39 }
 0x16a   :  { %1952 = vmatprep.subr.bf16.mxu1 %v3313_v53  ;;  %3020 = vmatpush3.bf16.msra.mxu0 %v3337_v57 }
 0x16b   :  { %3021 = vmatprep.subr.bf16.mxu0 %v3452_v37 }
 0x16c   :  { %1833 = vmatmul.mubr.bf16.gmra.mxu0 %v2890_v44  ;;  %1640 = vmatmul.mubr.bf16.vlgmr.msra.gmra.mxu1 %v2869_v11 }
 0x16d   :  { %1953 = vmatpush1.bf16.msra.mxu1 %v3311_v10  ;;  %1649 = vmatprep.mubr.bf16.mxu1 %v3451_v0 }
 0x16e   :  { %1954 = vmatprep.subr.bf16.mxu1 %v3316_v36  ;;  %3033 = vmatprep.mubr.msk.bf16.mxu0 %vm3453_vm8, %v3452_v37 }
 0x171   :  { %1955 = vmatpush1.bf16.msra.mxu1 %v3314_v15 }
 0x172   :  { %1956 = vmatprep.subr.bf16.mxu1 %v3319_v19 }
 0x174   :  { %1650 = vmatmul.mubr.bf16.gmra.mxu1 %v2870_v18 }
 0x175   :  { %1957 = vmatpush1.bf16.msra.mxu1 %v3317_v28  ;;  %1984 = vmatprep.mubr.bf16.mxu1 %v3451_v0 }
 0x176   :  { %1958 = vmatprep.subr.bf16.mxu1 %v3322_v3 }
 0x179   :  { %1959 = vmatpush1.bf16.msra.mxu1 %v3320_v24 }
 0x17a   :  { %1960 = vmatprep.subr.bf16.mxu1 %v3325_v58 }
 0x17d   :  { %1961 = vmatpush1.bf16.msra.mxu1 %v3323_v5 }
 0x17e   :  { %1962 = vmatprep.subr.bf16.mxu1 %v3328_v60 }
 0x181   :  { %1963 = vmatpush1.bf16.msra.mxu1 %v3326_v30 }
 0x182   :  { %1964 = vmatprep.subr.bf16.mxu1 %v3331_v16 }
 0x185   :  { %1965 = vmatpush1.bf16.msra.mxu1 %v3329_v33 }
 0x186   :  { %1966 = vmatprep.subr.bf16.mxu1 %v3334_v35 }
 0x189   :  { %1967 = vmatpush1.bf16.msra.mxu1 %v3332_v55 }
 0x18a   :  { %3037 = vmatprep.subr.bf16.mxu1 %v3452_v37 }
 0x18c   :  { %1985 = vmatmul.mubr.bf16.vlgmr.msra.gmra.mxu1 %v1868_v32 }
 0x18d   :  { %1994 = vmatprep.mubr.bf16.mxu1 %v3451_v0  ;;  %3038 = vmatpush3.bf16.msra.mxu1 %v3336_v54  ;;  %v3339_v0 = vld [vmem:[#allocation5 + $0x28] sm:$0xff]  }
 0x18e   :  { %3039 = vmatprep.subr.bf16.mxu1 %v3452_v37  ;;  %3022 = vmatpush3.bf16.msra.mxu0 %v3339_v0  ;;  %v2923_v0 = vld [vmem:[%s4238_s4] ss:$0 sm:$0xff] }
 0x18f   :  { %3023 = vmatprep.subr.bf16.mxu0 %v3452_v37 }
 0x191   :  { %3040 = vmatpush3.bf16.msra.mxu1 %v3338_v4 }
 0x192   :  { %3041 = vmatprep.subr.bf16.mxu1 %v3452_v37  ;;  %3024 = vmatpush3.bf16.msra.mxu0 %v3341_v23 }
 0x193   :  { %3025 = vmatprep.subr.bf16.mxu0 %v3452_v37 }
 0x194   :  { %1995 = vmatmul.mubr.bf16.gmra.mxu1 %v4061_v6  ;;  %v3340_v6 = vld [vmem:[#allocation5 + $0x68] sm:$0xff]  }
 0x195   :  { %3042 = vmatpush3.bf16.msra.mxu1 %v3340_v6  ;;  %3053 = vmatprep.mubr.msk.bf16.mxu1 %vm3453_vm8, %v3452_v37 }
 0x196   :  { %3043 = vmatprep.subr.bf16.mxu1 %v3452_v37  ;;  %3026 = vmatpush3.bf16.msra.mxu0 %v3343_v47 }
 0x197   :  { %3027 = vmatprep.subr.bf16.mxu0 %v3452_v37 }
 0x199   :  { %3044 = vmatpush3.bf16.msra.mxu1 %v3342_v17 }
 0x19a   :  { %3045 = vmatprep.subr.bf16.mxu1 %v3452_v37  ;;  %3028 = vmatpush3.bf16.msra.mxu0 %v3345_v7 }
 0x19b   :  { %3029 = vmatprep.subr.bf16.mxu0 %v3452_v37 }
 0x19d   :  { %3046 = vmatpush3.bf16.msra.mxu1 %v3344_v1 }
 0x19e   :  { %3047 = vmatprep.subr.bf16.mxu1 %v3452_v37  ;;  %3030 = vmatpush3.bf16.msra.mxu0 %v3347_v25 }
 0x19f   :  { %3031 = vmatprep.subr.bf16.mxu0 %v3452_v37 }
 0x1a1   :  { %3048 = vmatpush3.bf16.msra.mxu1 %v3346_v31 }
 0x1a2   :  { %3049 = vmatprep.subr.bf16.mxu1 %v3452_v37  ;;  %3032 = vmatpush3.bf16.msra.mxu0 %v3349_v48 }
 0x1a3   :  { %3057 = vmatprep.subr.bf16.mxu0 %v3452_v37 }
 0x1a5   :  { %3050 = vmatpush3.bf16.msra.mxu1 %v3348_v26 }
 0x1a6   :  { %3051 = vmatprep.subr.bf16.mxu1 %v3452_v37 }
 0x1a9   :  { %3052 = vmatpush3.bf16.msra.mxu1 %v3350_v50 }
 0x1aa   :  { %3077 = vmatprep.subr.bf16.mxu1 %v3452_v37 }
 0x204   :  { %v1469_v27 = vpop.f32.mrf.mxu0 }
 0x206   :  { %v1471_v41 = vpop.f32.mrf.mxu0 }
 0x208   :  { %v1473_v42 = vpop.f32.mrf.mxu0 }
 0x20a   :  { %v1475_v61 = vpop.f32.mrf.mxu0 }
 0x20c   :  { %v1332_v8 = vpop.f32.mrf.mxu1 }
 0x20d   :  { %v1470_v40 = vadd.f32 %v1469_v27, %v1332_v8 }
 0x20e   :  { %v1334_v62 = vpop.f32.mrf.mxu1 }
 0x20f   :  { %v1472_v28 = vadd.f32 %v1471_v41, %v1334_v62 }
 0x210   :  { %v1336_v63 = vpop.f32.mrf.mxu1 }
 0x211   :  { %v1474_v58 = vadd.f32 %v1473_v42, %v1336_v63 }
 0x212   :  { %v1338_v52 = vpop.f32.mrf.mxu1 }
 0x213   :  { %v1479_v45 = vpop.f32.mrf.mxu0  ;;  %v1476_v60 = vadd.f32 %v1475_v61, %v1338_v52  ;;  %v2028_v52 = vand.u32 2, %v3953_v12 }
 0x215   :  { %v1481_v22 = vpop.f32.mrf.mxu0  ;;  %vm4145_vm9 = vcmp.eq.s32.totalorder %v2028_v52, 0  ;;  %v3351_v52 = vld [vmem:[#allocation5 + $0xb8] sm:$0xff]  }
 0x216   :  { %v1342_v39 = vpop.f32.mrf.mxu1 }
 0x217   :  { %v1483_v10 = vpop.f32.mrf.mxu0  ;;  %v1480_v32 = vadd.f32 %v1479_v45, %v1342_v39 }
 0x218   :  { %v1344_v38 = vpop.f32.mrf.mxu1 }
 0x219   :  { %v1485_v11 = vpop.f32.mrf.mxu0  ;;  %v1482_v13 = vadd.f32 %v1481_v22, %v1344_v38 }
 0x21a   :  { %v1346_v53 = vpop.f32.mrf.mxu1 }
 0x21b   :  { %v1484_v31 = vadd.f32 %v1483_v10, %v1346_v53  ;;  %v2029_v10 = vand.u32 2, %v3956_v20  ;;  %v2030_v20 = vand.u32 2, %v3967_v51 }
 0x21c   :  { %v1348_v34 = vpop.f32.mrf.mxu1 }
 0x21d   :  { %v1486_v26 = vadd.f32 %v1485_v11, %v1348_v34  ;;  %vm2033_vm11 = vcmp.eq.s32.totalorder %v2029_v10, 0  ;;  %vm2034_vm12 = vcmp.eq.s32.totalorder %v2030_v20, 0  ;;  %v3361_v34 = vld [vmem:[#allocation5 + $0x90] sm:$0xff]  }
 0x21e   :  { %v3362_v10 = vld [vmem:[#allocation5 + $0xd0] sm:$0xff]  }
 0x21f   :  { %v3368_v20 = vld [vmem:[%s4241_s7 + $0x30] sm:$0xff]  }
 0x224   :  { %v1824_v14 = vpop.f32.mrf.mxu0 }
 0x226   :  { %v1826_v9 = vpop.f32.mrf.mxu0 }
 0x228   :  { %v1828_v21 = vpop.f32.mrf.mxu0 }
 0x22a   :  { %v1830_v18 = vpop.f32.mrf.mxu0 }
 0x22c   :  { %v1641_v56 = vpop.f32.mrf.mxu1  ;;  %v1834_v30 = vpop.f32.mrf.mxu0 }
 0x22d   :  { %v1660_v3 = vadd.f32 %v1641_v56, %v1470_v40 }
 0x22e   :  { %v1643_v43 = vpop.f32.mrf.mxu1  ;;  %v1836_v4 = vpop.f32.mrf.mxu0 }
 0x22f   :  { %v1661_v24 = vadd.f32 %v1643_v43, %v1472_v28  ;;  %v1843_v55 = vadd.f32 %v1824_v14, %v1660_v3 }
 0x230   :  { %v1645_v44 = vpop.f32.mrf.mxu1  ;;  %v1838_v62 = vpop.f32.mrf.mxu0 }
 0x231   :  { %v1662_v16 = vadd.f32 %v1645_v44, %v1474_v58  ;;  %v1844_v46 = vadd.f32 %v1826_v9, %v1661_v24 }
 0x232   :  { %v1647_v36 = vpop.f32.mrf.mxu1  ;;  %v1840_v53 = vpop.f32.mrf.mxu0 }
 0x233   :  { %v1663_v35 = vadd.f32 %v1647_v36, %v1476_v60  ;;  %v1845_v6 = vadd.f32 %v1828_v21, %v1662_v16 }
 0x234   :  { %v1651_v15 = vpop.f32.mrf.mxu1 }
 0x235   :  { %v1664_v17 = vadd.f32 %v1651_v15, %v1480_v32  ;;  %v1846_v7 = vadd.f32 %v1830_v18, %v1663_v35 }
 0x236   :  { %v1653_v19 = vpop.f32.mrf.mxu1 }
 0x237   :  { %v1665_v47 = vadd.f32 %v1653_v19, %v1482_v13  ;;  %v1847_v38 = vadd.f32 %v1834_v30, %v1664_v17 }
 0x238   :  { %v1655_v29 = vpop.f32.mrf.mxu1 }
 0x239   :  { %v1666_v63 = vadd.f32 %v1655_v29, %v1484_v31  ;;  %v1848_v42 = vadd.f32 %v1836_v4, %v1665_v47 }
 0x23a   :  { %v1657_v5 = vpop.f32.mrf.mxu1 }
 0x23b   :  { %v1667_v39 = vadd.f32 %v1657_v5, %v1486_v26  ;;  %v1849_v44 = vadd.f32 %v1838_v62, %v1666_v63  ;;  %v2031_v5 = vand.u32 2, %v3995_v49 }
 0x23d   :  { %v1850_v15 = vadd.f32 %v1840_v53, %v1667_v39  ;;  %vm2035_vm13 = vcmp.eq.s32.totalorder %v2031_v5, 0  ;;  %v3360_v53 = vld [vmem:[#allocation5 + $0xd8] sm:$0xff]  }
 0x23e   :  { %v3371_v5 = vld [vmem:[%s4241_s7 + $0x18] sm:$0xff]  }
 0x24c   :  { %v1986_v33 = vpop.f32.mrf.mxu1 }
 0x24d   :  { %v2005_v54 = vadd.f32 %v1986_v33, %v1843_v55 }
 0x24e   :  { %v1988_v59 = vpop.f32.mrf.mxu1 }
 0x24f   :  { %v2006_v57 = vadd.f32 %v1988_v59, %v1844_v46 }
 0x250   :  { %v1990_v23 = vpop.f32.mrf.mxu1 }
 0x251   :  { %v2013_v1 = vmax.f32 %v2005_v54, %v2006_v57  ;;  %v2007_v50 = vadd.f32 %v1990_v23, %v1845_v6 }
 0x252   :  { %v1992_v25 = vpop.f32.mrf.mxu1 }
 0x253   :  { %v2024_v48 = vadd.f32 %v2923_v0, %v2013_v1  ;;  %v2008_v8 = vadd.f32 %v1992_v25, %v1846_v7 }
 0x254   :  { %v1996_v27 = vpop.f32.mrf.mxu1 }
 0x255   :  { %v2014_v41 = vmax.f32 %v2007_v50, %v2008_v8  ;;  %v2053_v61 = vrot.slane %v2024_v48, 6  ;;  %v2009_v22 = vadd.f32 %v1996_v27, %v1847_v38  ;;  %v2041_v11 = vrot.slane %v2024_v48, 2  ;;  %v3352_v27 = vld [vmem:[#allocation5 + $0xf8] sm:$0xff]   ;;  %v3353_v38 = vld [vmem:[#allocation5 + $0xb0] sm:$0xff]  }
 0x256   :  { %v1998_v45 = vpop.f32.mrf.mxu1 }
 0x257   :  { %v2025_v56 = vadd.f32 %v2923_v0, %v2014_v41  ;;  %v2010_v43 = vadd.f32 %v1998_v45, %v1848_v42  ;;  %v2064_v9 = vsel %vm238_vm0, %v2024_v48, %v2053_v61  ;;  %v3354_v42 = vld [vmem:[#allocation5 + $0xf0] sm:$0xff]   ;;  %v3356_v45 = vld [vmem:[#allocation5 + $0xe8] sm:$0xff]  }
 0x258   :  { %v2000_v12 = vpop.f32.mrf.mxu1 }
 0x259   :  { %v2042_v36 = vrot.slane %v2025_v56, 2  ;;  %v2015_v14 = vmax.f32 %v2009_v22, %v2010_v43  ;;  %v2054_v19 = vrot.slane %v2025_v56, 6  ;;  %v2011_v28 = vadd.f32 %v2000_v12, %v1849_v44  ;;  %v3358_v22 = vld [vmem:[#allocation5 + $0xe0] sm:$0xff]   ;;  %v3359_v43 = vld [vmem:[#allocation5 + $0x98] sm:$0xff]   ;;  %v3363_v12 = vld [vmem:[#allocation5 + $0x88] sm:$0xff]  }
 0x25a   :  { %v2002_v21 = vpop.f32.mrf.mxu1 }
 0x25b   :  { %v2043_v29 = vsel %vm2040_vm10, %v2041_v11, %v2042_v36  ;;  %v2026_v40 = vadd.f32 %v2923_v0, %v2015_v14  ;;  %v2012_v18 = vadd.f32 %v2002_v21, %v1850_v15  ;;  %v2055_v16 = vsel %vm238_vm0, %v2053_v61, %v2054_v19  ;;  %v3355_v61 = vld [vmem:[#allocation5 + $0xa8] sm:$0xff]  }
 0x25c   :  { %v2065_v3 = vsel %vm4145_vm9, %v2043_v29, %v2064_v9  ;;  %v3364_v11 = vld [vmem:[#allocation5 + $0xc8] sm:$0xff]   ;;  %v3365_v9 = vld [vmem:[#allocation5 + $0x80] sm:$0xff]  }
 0x25d   :  { %v2044_v24 = vrot.slane %v2026_v40, 2  ;;  %v2016_v58 = vmax.f32 %v2011_v28, %v2012_v18  ;;  %v2069_v60 = vmax.f32 %v2024_v48, %v2065_v3  ;;  %v2056_v30 = vrot.slane %v2026_v40, 6  ;;  %v3367_v3 = vld [vmem:[%s4241_s7 + $0x38] sm:$0xff]  }
 0x25f   :  { %v2045_v33 = vsel %vm2040_vm10, %v2042_v36, %v2044_v24  ;;  %v2027_v35 = vadd.f32 %v2923_v0, %v2016_v58  ;;  %v2073_v13 = vmax.f32 %v2069_v60, 0.0  ;;  %v2057_v51 = vsel %vm238_vm0, %v2054_v19, %v2056_v30  ;;  %v3366_v19 = vld [vmem:[#allocation5 + $0xc0] sm:$0xff]   ;;  %v3372_v60 = vld [vmem:[%s4241_s7 + $0x10] sm:$0xff]  }
 0x260   :  { %v2066_v55 = vsel %vm2033_vm11, %v2045_v33, %v2055_v16  ;;  %v3370_v58 = vld [vmem:[%s4241_s7 + $0x20] sm:$0xff]  }
 0x261   :  { %v2070_v46 = vmax.f32 %v2025_v56, %v2066_v55  ;;  %v2046_v59 = vrot.slane %v2027_v35, 2  ;;  %v2058_v32 = vrot.slane %v2027_v35, 6  ;;  %v3357_v56 = vld [vmem:[#allocation5 + $0xa0] sm:$0xff]  }
 0x262   :  { %v3374_v16 = vld [vmem:[%s4241_s7] sm:$0xff]  }
 0x263   :  { %v2074_v54 = vmax.f32 %v2070_v46, 0.0  ;;  %v2047_v57 = vsel %vm2040_vm10, %v2044_v24, %v2046_v59  ;;  %v2052_v49 = vsel %vm2040_vm10, %v2046_v59, %v2027_v35  ;;  %v2059_v4 = vsel %vm238_vm0, %v2056_v30, %v2058_v32  ;;  %v3369_v24 = vld [vmem:[%s4241_s7 + $0x28] sm:$0xff]  }
 0x264   :  { %v2067_v6 = vsel %vm2034_vm12, %v2047_v57, %v2057_v51  ;;  %v2068_v23 = vsel %vm2035_vm13, %v2052_v49, %v2059_v4  ;;  %v3373_v30 = vld [vmem:[%s4241_s7 + $0x8] sm:$0xff]  }
 0x265   :  { %v2071_v17 = vmax.f32 %v2026_v40, %v2067_v6  ;;  %v2072_v0 = vmax.f32 %v2027_v35, %v2068_v23  ;;  %v4162_v47 = vpack.c.bf16 %v2074_v54, %v2073_v13  ;;  %v2932_v54 = vld [vmem:[%s4240_s6] ss:$0 sm:$0xff]  ;;  %s3454_s6 = smov [#allocation7]  }
 0x267   :  { %v2075_v1 = vmax.f32 %v2071_v17, 0.0  ;;  %v2076_v7 = vmax.f32 %v2072_v0, 0.0  ;;  %v2098_v25 = vunpack.c.l.b16 %v4162_v47  ;;  %v2328_v36 = vunpack.c.h.b16 %v4162_v47 }
 0x269   :  { %v2078_v31 = vpack.c.bf16 %v2076_v7, %v2075_v1  ;;  %v2217_v50 = vrot.slane %v2098_v25, 4  ;;  %v2440_v21 = vrot.slane %v2328_v36, 4 }
 0x26b   :  { %v2099_v26 = vunpack.c.l.b16 %v2078_v31  ;;  %v2329_v44 = vunpack.c.h.b16 %v2078_v31 }
 0x26d   :  { %v2100_v48 = vrot.slane %v2099_v26, 7  ;;  %v2218_v8 = vrot.slane %v2099_v26, 3  ;;  %v2330_v14 = vrot.slane %v2329_v44, 7  ;;  %v2441_v15 = vrot.slane %v2329_v44, 3 }
 0x26f   :  { %v2102_v62 = vsel %vm2101_vm14, %v2100_v48, %v2098_v25  ;;  %v2219_v63 = vsel %vm2101_vm14, %v2218_v8, %v2217_v50  ;;  %v2331_v29 = vsel %vm2101_vm14, %v2330_v14, %v2328_v36  ;;  %v2442_v40 = vsel %vm2101_vm14, %v2441_v15, %v2440_v21  ;;  %v2957_v50 = vld [vmem:[%s4242_s8] ss:$0 sm:$0xff]  ;;  %s2671_s8 = sshll.u32 %s3454_s6, 4  ;;  %s2672_s8 = int_to_ptr.vmem [resolvable:$true] %s2671_s8 }
 0x270   :  { %v2103_v39 = vpack.c.b16 %v2102_v62, %v2102_v62  ;;  %v2220_v41 = vpack.c.b16 %v2219_v63, %v2219_v63  ;;  %v2332_v28 = vpack.c.b16 %v2331_v29, %v2331_v29  ;;  %v2443_v18 = vpack.c.b16 %v2442_v40, %v2442_v40  ;;  %s3419_s26 = scalar_lea.vmem %s2672_s8, 32  ;;  %p3424_p11 = scmp.lt.s32.totalorder %s2672_s8, %s2672_s8 }
 0x271   :  { %v2648_v48 = vand.u32 127, %v1064_v2  ;;  %p3420_p10 = scmp.ne.s32.totalorder %s2672_s8, %s3419_s26  ;;  %p3425_p12 = scmp.lt.s32.totalorder %s3419_s26, %s3419_s26 }
 0x272   :  { %3034 = vmatmul.mubr.bf16.vlgmr.msra.gmra.mxu0 %v2103_v39  ;;  %3054 = vmatmul.mubr.bf16.vlgmr.msra.gmra.mxu1 %v2220_v41 }
 0x273   :  { %3058 = vmatpush3.bf16.msra.mxu0 %v3351_v52  ;;  %3078 = vmatpush3.bf16.msra.mxu1 %v3352_v27  ;;  %vm2649_vm15 = vcmp.lt.s32.totalorder %v2648_v48, 10  ;;  %p3426_p13 = por %p3425_p12, %p3424_p11 }
 0x274   :  { %3059 = vmatprep.subr.bf16.mxu0 %v3452_v37  ;;  %3079 = vmatprep.subr.bf16.mxu1 %v3452_v37 }
 0x275   :  { %3073 = vmatprep.mubr.msk.bf16.mxu0 %vm3453_vm8, %v3452_v37  ;;  %3093 = vmatprep.mubr.msk.bf16.mxu1 %vm3453_vm8, %v3452_v37  ;;  %p3427_p0 = pnand %p3426_p13, %p3420_p10 }
 0x277   :  { %3060 = vmatpush3.bf16.msra.mxu0 %v3353_v38  ;;  %3080 = vmatpush3.bf16.msra.mxu1 %v3354_v42 }
 0x278   :  { %3061 = vmatprep.subr.bf16.mxu0 %v3452_v37  ;;  %3081 = vmatprep.subr.bf16.mxu1 %v3452_v37 }
 0x27b   :  { %3062 = vmatpush3.bf16.msra.mxu0 %v3355_v61  ;;  %3082 = vmatpush3.bf16.msra.mxu1 %v3356_v45 }
 0x27c   :  { %3063 = vmatprep.subr.bf16.mxu0 %v3452_v37  ;;  %3083 = vmatprep.subr.bf16.mxu1 %v3452_v37 }
 0x27f   :  { %3064 = vmatpush3.bf16.msra.mxu0 %v3357_v56  ;;  %3084 = vmatpush3.bf16.msra.mxu1 %v3358_v22 }
 0x280   :  { %3065 = vmatprep.subr.bf16.mxu0 %v3452_v37  ;;  %3085 = vmatprep.subr.bf16.mxu1 %v3452_v37 }
 0x283   :  { %3066 = vmatpush3.bf16.msra.mxu0 %v3359_v43  ;;  %3086 = vmatpush3.bf16.msra.mxu1 %v3360_v53 }
 0x284   :  { %3067 = vmatprep.subr.bf16.mxu0 %v3452_v37  ;;  %3087 = vmatprep.subr.bf16.mxu1 %v3452_v37 }
 0x287   :  { %3068 = vmatpush3.bf16.msra.mxu0 %v3361_v34  ;;  %3088 = vmatpush3.bf16.msra.mxu1 %v3362_v10 }
 0x288   :  { %3069 = vmatprep.subr.bf16.mxu0 %v3452_v37  ;;  %3089 = vmatprep.subr.bf16.mxu1 %v3452_v37 }
 0x28b   :  { %3070 = vmatpush3.bf16.msra.mxu0 %v3363_v12  ;;  %3090 = vmatpush3.bf16.msra.mxu1 %v3364_v11 }
 0x28c   :  { %3071 = vmatprep.subr.bf16.mxu0 %v3452_v37  ;;  %3091 = vmatprep.subr.bf16.mxu1 %v3452_v37 }
 0x28f   :  { %3072 = vmatpush3.bf16.msra.mxu0 %v3365_v9  ;;  %3092 = vmatpush3.bf16.msra.mxu1 %v3366_v19 }
 0x290   :  { %3097 = vmatprep.subr.bf16.mxu0 %v3452_v37 }
 0x292   :  { %3074 = vmatmul.mubr.bf16.vlgmr.msra.gmra.mxu0 %v2332_v28  ;;  %3094 = vmatmul.mubr.bf16.vlgmr.msra.gmra.mxu1 %v2443_v18 }
 0x293   :  { %3113 = vmatprep.mubr.msk.bf16.mxu0 %vm3453_vm8, %v3452_v37  ;;  %3098 = vmatpush3.bf16.msra.mxu0 %v3367_v3 }
 0x294   :  { %3099 = vmatprep.subr.bf16.mxu0 %v3452_v37 }
 0x297   :  { %3100 = vmatpush3.bf16.msra.mxu0 %v3368_v20 }
 0x298   :  { %3101 = vmatprep.subr.bf16.mxu0 %v3452_v37 }
 0x29b   :  { %3102 = vmatpush3.bf16.msra.mxu0 %v3369_v24 }
 0x29c   :  { %3103 = vmatprep.subr.bf16.mxu0 %v3452_v37 }
 0x29f   :  { %3104 = vmatpush3.bf16.msra.mxu0 %v3370_v58 }
 0x2a0   :  { %3105 = vmatprep.subr.bf16.mxu0 %v3452_v37 }
 0x2a3   :  { %3106 = vmatpush3.bf16.msra.mxu0 %v3371_v5 }
 0x2a4   :  { %3107 = vmatprep.subr.bf16.mxu0 %v3452_v37 }
 0x2a7   :  { %3108 = vmatpush3.bf16.msra.mxu0 %v3372_v60 }
 0x2a8   :  { %3109 = vmatprep.subr.bf16.mxu0 %v3452_v37 }
 0x2ab   :  { %3110 = vmatpush3.bf16.msra.mxu0 %v3373_v30 }
 0x2ac   :  { %3111 = vmatprep.subr.bf16.mxu0 %v3452_v37 }
 0x2af   :  { %3112 = vmatpush3.bf16.msra.mxu0 %v3374_v16 }
 0x332   :  { %v2187_v33 = vpop.f32.mrf.mxu0  ;;  %v2304_v35 = vpop.f32.mrf.mxu1 }
 0x333   :  { %v2199_v57 = vadd.f32 %v2932_v54, %v2187_v33 }
 0x334   :  { %v3035_v55 = vpop.f32.mrf.mxu0  ;;  %v3055_v46 = vpop.f32.mrf.mxu1 }
 0x335   :  { %v2310_v49 = vadd.f32 %v2304_v35, %v2199_v57 }
 0x336   :  { %v2190_v59 = vpop.f32.mrf.mxu0  ;;  %v2307_v32 = vpop.f32.mrf.mxu1 }
 0x338   :  { %v3036_v13 = vpop.f32.mrf.mxu0  ;;  %v3056_v51 = vpop.f32.mrf.mxu1 }
 0x352   :  { %v2416_v4 = vpop.f32.mrf.mxu0  ;;  %v2527_v6 = vpop.f32.mrf.mxu1 }
 0x353   :  { %v2422_v23 = vadd.f32 %v2416_v4, %v2310_v49 }
 0x354   :  { %v3075_v17 = vpop.f32.mrf.mxu0  ;;  %v3095_v37 = vpop.f32.mrf.mxu1 }
 0x355   :  { %v2533_v0 = vadd.f32 %v2527_v6, %v2422_v23 }
 0x356   :  { %v2419_v47 = vpop.f32.mrf.mxu0  ;;  %v2530_v1 = vpop.f32.mrf.mxu1 }
 0x357   :  { %v2534_v7 = vmax.f32 %v2533_v0, 0.0 }
 0x358   :  { %v3076_v31 = vpop.f32.mrf.mxu0  ;;  %v3096_v25 = vpop.f32.mrf.mxu1 }
 0x359   :  { %v2535_v26 = vpack.c.bf16 %v2534_v7, %v2534_v7 }
 0x35b   :  { %3114 = vmatmul.mubr.bf16.vlgmr.msra.gmra.mxu0 %v2535_v26 }
 0x41b   :  { %v2641_v8 = vpop.f32.mrf.mxu0 }
 0x41c   :  { %v2642_v62 = vadd.f32 %v2957_v50, %v2641_v8 }
 0x41d   :  { %v3115_v63 = vpop.f32.mrf.mxu0 }
 0x41e   :  { %v2650_v52 = vsel %vm2649_vm15, %v2642_v62, -1e+30 }
 0x41f   :  { %v2644_v27 = vpop.f32.mrf.mxu0  ;;  %v2651_v39 = vsel %vm238_vm0, %v2650_v52, -inf }
 0x420   :  { %2652 = vmax.xlane.f32.xlu0 %v2651_v39 }
 0x421   :  { %v3116_v41 = vpop.f32.mrf.mxu0 }
 0x4a9   :  { %v2653_v38 = vpop.xlane.xlu0 %2652 }
 0x4aa   :  { %v2654_v42 = vsub.f32 %v2642_v62, %v2653_v38 }
 0x4ac   :  { %v2655_v61 = vmul.f32 1.442695, %v2654_v42 }
 0x4ae   :  { %3375 = vpow2.f32 %v2655_v61 }
 0x4bb   :  { %v3376_v45 = vpop.eup %3375 }
 0x4bc   :  { %v2657_v2 = vsel %vm2649_vm15, %v3376_v45, 0.0 }
 0x4bd   :  { %v2658_v56 = vsel %vm238_vm0, %v2657_v2, 0.0 }
 0x4be   :  { %2659 = vadd.xlane.f32.xlu0 %v2658_v56 }
 0x547   :  { %v2660_v22 = vpop.xlane.xlu0 %2659 }
 0x548   :  { %3377 = vlog2.f32 %v2660_v22 }
 0x555   :  { %v3378_v43 = vpop.eup %3377 }
 0x556   :  { %v2662_v53 = vmul.f32 0.6931472, %v3378_v43 }
 0x558   :  { %v2663_v34 = vsub.f32 %v2654_v42, %v2662_v53 }
 0x55a   :  { %2664 = vst [vmem:[#allocation7] sm:$0x3] %v2663_v34 }
 0x55b   :  { %3430 = shalt.err (!%p3427_p0)
}
 0x55c   :  { %2674 = dma.vmem_to_hbm [thread:$0]  %s2672_s8, 32, %s4243_s9, [#allocation4]  }
 0x55d   :  { %3443 = dma.done.wait [#allocation4], 32  }
 0x55e   :  { %3444 = vsyncadd [#allocation4], 4294967264 }
 0x55f   :  { %2678 = vsyncpa [#allocation3], 1 }
 0x560   :  { %2679 = vsyncpa [#allocation6], 1 }
 0x561   :  { %2680 = vsyncpa [#allocation4], 1 }

</bundles_post_ra>
